<compile_context>
chip_gen: v7x
topology: tpu7x:2x2x1
jax: 0.10.0
libtpu: 0.0.40
codegen_flags: <defaults>
</compile_context>

<pallas_src>
from functools import partial

import jax
import jax.numpy as jnp
from jax import lax
from jax.experimental import pallas as pl
from jax.experimental.pallas import tpu as pltpu

SOS_TOKEN = 1


def _gru_gates(gx, gh, h, H):
    """PyTorch GRU cell gate math from fused (1,3H) input/hidden projections."""
    r = jax.nn.sigmoid(gx[:, 0:H] + gh[:, 0:H])
    z = jax.nn.sigmoid(gx[:, H:2 * H] + gh[:, H:2 * H])
    n = jnp.tanh(gx[:, 2 * H:3 * H] + r * gh[:, 2 * H:3 * H])
    return (1.0 - z) * n + z * h


# -----------------------------------------------------------------------------
# One fused kernel: encoder GRU over the input sequence, then the full sampling
# ("probability search") decode loop with VMEM-resident weights.
# -----------------------------------------------------------------------------
def seq2seq_sample_kernel(us_ref,                    # SMEM (T,) f32 uniforms
                          x_ref,                     # (S, E) bf16 encoder input embeddings
                          emb_ref,                   # (V, E) bf16 embedding table
                          tri_ref,                   # (V, V) f32 upper-triangular ones
                          ewih_ref, ewhh_ref, ebih_ref, ebhh_ref,   # encoder GRU
                          dwih_ref, dwhh_ref, dbih_ref, dbhh_ref,   # decoder GRU
                          dwcat_ref,                 # (2H, H) bf16
                          dwout_ref, dbout_ref,      # (H, V) bf16, (1, V) f32
                          tokens_ref, scores_ref):   # SMEM outputs (T,)
    S, _ = x_ref.shape
    H = ewhh_ref.shape[0]
    V = dwout_ref.shape[1]
    T = tokens_ref.shape[0]

    # ---------------- encoder: GRU over the (short) input sequence ----------
    # Input projections hoisted out of the recurrence: one (S,E)x(E,3H) matmul.
    gx_all = (jnp.dot(x_ref[...], ewih_ref[...],
                      preferred_element_type=jnp.float32) + ebih_ref[...])     # (S, 3H)
    h = jnp.zeros((1, H), jnp.float32)
    rows = []
    for t in range(S):                                  # static unroll, runs once
        gx = gx_all[t:t + 1, :]                         # (1, 3H) static slice
        gh = (jnp.dot(h.astype(jnp.bfloat16), ewhh_ref[...],
                      preferred_element_type=jnp.float32) + ebhh_ref[...])
        h = _gru_gates(gx, gh, h, H)
        rows.append(h)
    enc = jnp.concatenate(rows, axis=0)                 # (S, H) f32, register-resident
    # TODO(synk): the source encoder's opaque `codes` tensor is undefined; it is
    # synthesized as mean-pooled encoder states and added to the attention ctx.
    codes = jnp.mean(enc, axis=0, keepdims=True)        # (1, H)

    # ---------------- loop-invariant vectors, hoisted ------------------------
    lane = lax.broadcasted_iota(jnp.int32, (1, V), 1)   # lane index iota
    lane_f = lane.astype(jnp.float32)
    first_lane = lane == 0
    last_lane = (lane == V - 1).astype(jnp.float32)

    # initial fed-back input = embedding of SOS (static row slice, once)
    x0 = emb_ref[SOS_TOKEN:SOS_TOKEN + 1, :]            # (1, E) bf16

    # ---------------- sampling decode loop -----------------------------------
    def dec_step(t, carry):
        x, h = carry                                    # (1,E) bf16, (1,H) f32

        # fused GRU cell: two (1,*) x (*,3H) matmuls
        gx = (jnp.dot(x, dwih_ref[...],
                      preferred_element_type=jnp.float32) + dbih_ref[...])
        gh = (jnp.dot(h.astype(jnp.bfloat16), dwhh_ref[...],
                      preferred_element_type=jnp.float32) + dbhh_ref[...])
        h_new = _gru_gates(gx, gh, h, H)

        # Luong "dot" attention over encoder outputs (f32 operands, tiny S)
        att = lax.dot_general(h_new, enc, (((1,), (1,)), ((), ())),
                              preferred_element_type=jnp.float32)              # (1, S)
        att = jnp.exp(att - jnp.max(att, axis=-1, keepdims=True))
        att = att * pl.reciprocal(jnp.sum(att, axis=-1, keepdims=True), approx=True)
        ctx = jnp.dot(att, enc, preferred_element_type=jnp.float32) + codes     # (1, H)

        # combine projection split into two independent (1,H)x(H,H) matmuls
        # (avoids the per-step (1,2H) lane concat; pipelines on all chips)
        h_bf = h_new.astype(jnp.bfloat16)
        cat = jnp.tanh(
            jnp.dot(h_bf, dwcat_ref[0:H, :], preferred_element_type=jnp.float32)
            + jnp.dot(ctx.astype(jnp.bfloat16), dwcat_ref[H:2 * H, :],
                      preferred_element_type=jnp.float32))                      # (1, H)

        # output projection + softmax (exact normalization for the pick)
        logits = (jnp.dot(cat.astype(jnp.bfloat16), dwout_ref[...],
                          preferred_element_type=jnp.float32) + dbout_ref[...]) # (1, V)
        logits = logits - jnp.max(logits, axis=-1, keepdims=True)
        e = jnp.exp(logits)
        probs = e / jnp.sum(e, axis=-1, keepdims=True)                          # (1, V)

        # inverse-CDF pick (my_random_pick): inclusive prefix sum via one
        # (1,V)x(V,V) f32 MXU matmul against a resident triangular-ones matrix.
        cum = jnp.dot(probs, tri_ref[...], preferred_element_type=jnp.float32)  # (1, V)
        u = us_ref[t]
        gt = (cum > u).astype(jnp.float32)              # monotone 0...0 1...1
        gt = jnp.maximum(gt, last_lane)                 # python-loop fall-through -> V-1
        prev = jnp.where(first_lane, 0.0, pltpu.roll(gt, shift=1, axis=1))
        onehot = gt * (1.0 - prev)                      # exactly one 1 at the picked index

        # vector-domain feedback: next-step embedding via one MXU matmul
        x_next = jnp.dot(onehot.astype(jnp.bfloat16), emb_ref[...],
                         preferred_element_type=jnp.float32).astype(jnp.bfloat16)  # (1, E)

        # scalar outputs only (off the carried path)
        idx = jnp.sum(onehot * lane_f).astype(jnp.int32)
        score = jnp.sum(onehot * probs)
        tokens_ref[t] = idx
        scores_ref[t] = score
        return x_next, h_new

    lax.fori_loop(0, T, dec_step, (x0, h))


# -----------------------------------------------------------------------------
# wrapper
# -----------------------------------------------------------------------------
@partial(jax.jit, static_argnames=("max_length",))
def probability_search_decode(input_seq, input_length, max_length, params, key):
    """JAX/Pallas equivalent of ProbabilitySearchDecoder.forward."""
    # TODO(synk): reference packs/masks by input_length inside its opaque
    # encoder; here the full (padded) sequence is encoded and attended.
    del input_length

    emb = params["emb"]                                  # (V, E) bf16
    V, E = emb.shape
    H = params["enc_whh"].shape[0]
    emb_seq = emb[input_seq]                             # (S, E) gather (glue, once)
    S = emb_seq.shape[0]
    del H, S, E

    # deterministic replacement for python random.uniform(0, 1) per step
    us = jax.random.uniform(key, (max_length,), dtype=jnp.float32)

    # constant upper-triangular ones: cum[j] = sum_{i<=j} probs[i]
    tri = jnp.triu(jnp.ones((V, V), jnp.float32))

    vmem = pl.BlockSpec(memory_space=pltpu.MemorySpace.VMEM)
    smem = pl.BlockSpec(memory_space=pltpu.MemorySpace.SMEM)

    tokens, scores = pl.pallas_call(
        seq2seq_sample_kernel,
        out_shape=(jax.ShapeDtypeStruct((max_length,), jnp.int32),
                   jax.ShapeDtypeStruct((max_length,), jnp.float32)),
        in_specs=[smem] + [vmem] * 14,
        out_specs=(smem, smem),
    )(us, emb_seq, emb, tri,
      params["enc_wih"], params["enc_whh"], params["enc_bih"], params["enc_bhh"],
      params["dec_wih"], params["dec_whh"], params["dec_bih"], params["dec_bhh"],
      params["dec_wcat"], params["dec_wout"], params["dec_bout"])
    return tokens, scores


def init_params(key, V, E, H):
    ks = jax.random.split(key, 12)
    s = 0.1
    bf = jnp.bfloat16

    def nrm(k, shape, dtype=jnp.float32):
        return (s * jax.random.normal(k, shape, dtype=jnp.float32)).astype(dtype)

    return dict(
        emb=nrm(ks[0], (V, E), bf),
        enc_wih=nrm(ks[1], (E, 3 * H), bf),      # fused [r|z|n] input weights
        enc_whh=nrm(ks[2], (H, 3 * H), bf),      # fused [r|z|n] hidden weights
        enc_bih=nrm(ks[3], (1, 3 * H)),
        enc_bhh=nrm(ks[4], (1, 3 * H)),
        dec_wih=nrm(ks[5], (E, 3 * H), bf),
        dec_whh=nrm(ks[6], (H, 3 * H), bf),
        dec_bih=nrm(ks[7], (1, 3 * H)),
        dec_bhh=nrm(ks[8], (1, 3 * H)),
        dec_wcat=nrm(ks[9], (2 * H, H), bf),     # fused [h|ctx] combine weights
        dec_wout=nrm(ks[10], (H, V), bf),
        dec_bout=nrm(ks[11], (1, V)),
    )


if __name__ == "__main__":
    # lane-dense small shapes: H/E/V multiples of 128, 3H = 384
    V, E, H, S, MAX_LEN = 128, 128, 128, 8, 8
    root = jax.random.PRNGKey(0)
    k_param, k_seq, k_sample = jax.random.split(root, 3)

    params = init_params(k_param, V, E, H)
    input_seq = jax.random.randint(k_seq, (S,), 0, V, dtype=jnp.int32)
    input_length = jnp.array([S], dtype=jnp.int32)

    tokens, scores = probability_search_decode(
        input_seq, input_length, max_length=MAX_LEN, params=params, key=k_sample)
    jax.block_until_ready((tokens, scores))

    assert tokens.shape == (MAX_LEN,) and tokens.dtype == jnp.int32
    assert scores.shape == (MAX_LEN,) and scores.dtype == jnp.float32
    assert bool(jnp.all((tokens >= 0) & (tokens < V)))
    assert bool(jnp.all(jnp.isfinite(scores))) and bool(jnp.all(scores >= 0.0))
    print("KERNEL_OK")
</pallas_src>

<mosaic_0001>
module attributes {stable_mosaic.version = 11 : i64} {
  func.func @seq2seq_sample_kernel(%arg0: memref<8xf32, #tpu.memory_space<smem>>, %arg1: memref<8x128xbf16, #tpu.memory_space<vmem>>, %arg2: memref<128x128xbf16, #tpu.memory_space<vmem>>, %arg3: memref<128x128xf32, #tpu.memory_space<vmem>>, %arg4: memref<128x384xbf16, #tpu.memory_space<vmem>>, %arg5: memref<128x384xbf16, #tpu.memory_space<vmem>>, %arg6: memref<1x384xf32, #tpu.memory_space<vmem>>, %arg7: memref<1x384xf32, #tpu.memory_space<vmem>>, %arg8: memref<128x384xbf16, #tpu.memory_space<vmem>>, %arg9: memref<128x384xbf16, #tpu.memory_space<vmem>>, %arg10: memref<1x384xf32, #tpu.memory_space<vmem>>, %arg11: memref<1x384xf32, #tpu.memory_space<vmem>>, %arg12: memref<256x128xbf16, #tpu.memory_space<vmem>>, %arg13: memref<128x128xbf16, #tpu.memory_space<vmem>>, %arg14: memref<1x128xf32, #tpu.memory_space<vmem>>, %arg15: memref<8xi32, #tpu.memory_space<smem>>, %arg16: memref<8xf32, #tpu.memory_space<smem>>) attributes {dimension_semantics = [], scalar_prefetch = 0 : i64, scratch_operands = 0 : i64, tpu.core_type = #tpu.core_type<tc>} {
    %c0 = arith.constant 0 : index
    %c0_0 = arith.constant 0 : index
    %0 = vector.load %arg1[%c0, %c0_0] : memref<8x128xbf16, #tpu.memory_space<vmem>>, vector<8x128xbf16>
    %c0_1 = arith.constant 0 : index
    %c0_2 = arith.constant 0 : index
    %1 = vector.load %arg4[%c0_1, %c0_2] : memref<128x384xbf16, #tpu.memory_space<vmem>>, vector<128x384xbf16>
    %cst = arith.constant dense<0.000000e+00> : vector<8x384xf32>
    %2 = tpu.matmul %0, %1, %cst {dimension_numbers = #tpu.dot_dimension_numbers<[1], [0], [0], [1], [0, 0, 1, 1], [], []>} : vector<8x128xbf16>, vector<128x384xbf16>, vector<8x384xf32> -> vector<8x384xf32>
    %c0_3 = arith.constant 0 : index
    %c0_4 = arith.constant 0 : index
    %3 = vector.load %arg6[%c0_3, %c0_4] : memref<1x384xf32, #tpu.memory_space<vmem>>, vector<1x384xf32>
    %4 = vector.broadcast %3 : vector<1x384xf32> to vector<8x384xf32>
    %5 = arith.addf %2, %4 : vector<8x384xf32>
    %cst_5 = arith.constant 0.000000e+00 : f32
    %6 = vector.broadcast %cst_5 : f32 to vector<1x128xf32>
    %7 = vector.extract_strided_slice %5 {offsets = [0, 0], sizes = [1, 384], strides = [1, 1]} : vector<8x384xf32> to vector<1x384xf32>
    %8 = arith.truncf %6 : vector<1x128xf32> to vector<1x128xbf16>
    %c0_6 = arith.constant 0 : index
    %c0_7 = arith.constant 0 : index
    %9 = vector.load %arg5[%c0_6, %c0_7] : memref<128x384xbf16, #tpu.memory_space<vmem>>, vector<128x384xbf16>
    %cst_8 = arith.constant dense<0.000000e+00> : vector<1x384xf32>
    %10 = tpu.matmul %8, %9, %cst_8 {dimension_numbers = #tpu.dot_dimension_numbers<[1], [0], [0], [1], [0, 0, 1, 1], [], []>} : vector<1x128xbf16>, vector<128x384xbf16>, vector<1x384xf32> -> vector<1x384xf32>
    %c0_9 = arith.constant 0 : index
    %c0_10 = arith.constant 0 : index
    %11 = vector.load %arg7[%c0_9, %c0_10] : memref<1x384xf32, #tpu.memory_space<vmem>>, vector<1x384xf32>
    %12 = arith.addf %10, %11 : vector<1x384xf32>
    %13 = vector.extract_strided_slice %7 {offsets = [0, 0], sizes = [1, 128], strides = [1, 1]} : vector<1x384xf32> to vector<1x128xf32>
    %14 = vector.extract_strided_slice %12 {offsets = [0, 0], sizes = [1, 128], strides = [1, 1]} : vector<1x384xf32> to vector<1x128xf32>
    %15 = arith.addf %13, %14 : vector<1x128xf32>
    %16 = arith.negf %15 : vector<1x128xf32>
    %17 = math.exp %16 : vector<1x128xf32>
    %cst_11 = arith.constant 1.000000e+00 : f32
    %18 = vector.broadcast %cst_11 : f32 to vector<1x128xf32>
    %19 = arith.addf %18, %17 : vector<1x128xf32>
    %20 = arith.divf %18, %19 : vector<1x128xf32>
    %21 = vector.extract_strided_slice %7 {offsets = [0, 128], sizes = [1, 128], strides = [1, 1]} : vector<1x384xf32> to vector<1x128xf32>
    %22 = vector.extract_strided_slice %12 {offsets = [0, 128], sizes = [1, 128], strides = [1, 1]} : vector<1x384xf32> to vector<1x128xf32>
    %23 = arith.addf %21, %22 : vector<1x128xf32>
    %24 = arith.negf %23 : vector<1x128xf32>
    %25 = math.exp %24 : vector<1x128xf32>
    %cst_12 = arith.constant 1.000000e+00 : f32
    %26 = vector.broadcast %cst_12 : f32 to vector<1x128xf32>
    %27 = arith.addf %26, %25 : vector<1x128xf32>
    %28 = arith.divf %26, %27 : vector<1x128xf32>
    %29 = vector.extract_strided_slice %7 {offsets = [0, 256], sizes = [1, 128], strides = [1, 1]} : vector<1x384xf32> to vector<1x128xf32>
    %30 = vector.extract_strided_slice %12 {offsets = [0, 256], sizes = [1, 128], strides = [1, 1]} : vector<1x384xf32> to vector<1x128xf32>
    %31 = arith.mulf %20, %30 : vector<1x128xf32>
    %32 = arith.addf %29, %31 : vector<1x128xf32>
    %33 = math.tanh %32 : vector<1x128xf32>
    %cst_13 = arith.constant 1.000000e+00 : f32
    %34 = vector.broadcast %cst_13 : f32 to vector<1x128xf32>
    %35 = arith.subf %34, %28 : vector<1x128xf32>
    %36 = arith.mulf %35, %33 : vector<1x128xf32>
    %37 = arith.mulf %28, %6 : vector<1x128xf32>
    %38 = arith.addf %36, %37 : vector<1x128xf32>
    %39 = vector.extract_strided_slice %5 {offsets = [1, 0], sizes = [1, 384], strides = [1, 1]} : vector<8x384xf32> to vector<1x384xf32>
    %40 = arith.truncf %38 : vector<1x128xf32> to vector<1x128xbf16>
    %c0_14 = arith.constant 0 : index
    %c0_15 = arith.constant 0 : index
    %41 = vector.load %arg5[%c0_14, %c0_15] : memref<128x384xbf16, #tpu.memory_space<vmem>>, vector<128x384xbf16>
    %cst_16 = arith.constant dense<0.000000e+00> : vector<1x384xf32>
    %42 = tpu.matmul %40, %41, %cst_16 {dimension_numbers = #tpu.dot_dimension_numbers<[1], [0], [0], [1], [0, 0, 1, 1], [], []>} : vector<1x128xbf16>, vector<128x384xbf16>, vector<1x384xf32> -> vector<1x384xf32>
    %c0_17 = arith.constant 0 : index
    %c0_18 = arith.constant 0 : index
    %43 = vector.load %arg7[%c0_17, %c0_18] : memref<1x384xf32, #tpu.memory_space<vmem>>, vector<1x384xf32>
    %44 = arith.addf %42, %43 : vector<1x384xf32>
    %45 = vector.extract_strided_slice %39 {offsets = [0, 0], sizes = [1, 128], strides = [1, 1]} : vector<1x384xf32> to vector<1x128xf32>
    %46 = vector.extract_strided_slice %44 {offsets = [0, 0], sizes = [1, 128], strides = [1, 1]} : vector<1x384xf32> to vector<1x128xf32>
    %47 = arith.addf %45, %46 : vector<1x128xf32>
    %48 = arith.negf %47 : vector<1x128xf32>
    %49 = math.exp %48 : vector<1x128xf32>
    %cst_19 = arith.constant 1.000000e+00 : f32
    %50 = vector.broadcast %cst_19 : f32 to vector<1x128xf32>
    %51 = arith.addf %50, %49 : vector<1x128xf32>
    %52 = arith.divf %50, %51 : vector<1x128xf32>
    %53 = vector.extract_strided_slice %39 {offsets = [0, 128], sizes = [1, 128], strides = [1, 1]} : vector<1x384xf32> to vector<1x128xf32>
    %54 = vector.extract_strided_slice %44 {offsets = [0, 128], sizes = [1, 128], strides = [1, 1]} : vector<1x384xf32> to vector<1x128xf32>
    %55 = arith.addf %53, %54 : vector<1x128xf32>
    %56 = arith.negf %55 : vector<1x128xf32>
    %57 = math.exp %56 : vector<1x128xf32>
    %cst_20 = arith.constant 1.000000e+00 : f32
    %58 = vector.broadcast %cst_20 : f32 to vector<1x128xf32>
    %59 = arith.addf %58, %57 : vector<1x128xf32>
    %60 = arith.divf %58, %59 : vector<1x128xf32>
    %61 = vector.extract_strided_slice %39 {offsets = [0, 256], sizes = [1, 128], strides = [1, 1]} : vector<1x384xf32> to vector<1x128xf32>
    %62 = vector.extract_strided_slice %44 {offsets = [0, 256], sizes = [1, 128], strides = [1, 1]} : vector<1x384xf32> to vector<1x128xf32>
    %63 = arith.mulf %52, %62 : vector<1x128xf32>
    %64 = arith.addf %61, %63 : vector<1x128xf32>
    %65 = math.tanh %64 : vector<1x128xf32>
    %cst_21 = arith.constant 1.000000e+00 : f32
    %66 = vector.broadcast %cst_21 : f32 to vector<1x128xf32>
    %67 = arith.subf %66, %60 : vector<1x128xf32>
    %68 = arith.mulf %67, %65 : vector<1x128xf32>
    %69 = arith.mulf %60, %38 : vector<1x128xf32>
    %70 = arith.addf %68, %69 : vector<1x128xf32>
    %71 = vector.extract_strided_slice %5 {offsets = [2, 0], sizes = [1, 384], strides = [1, 1]} : vector<8x384xf32> to vector<1x384xf32>
    %72 = arith.truncf %70 : vector<1x128xf32> to vector<1x128xbf16>
    %c0_22 = arith.constant 0 : index
    %c0_23 = arith.constant 0 : index
    %73 = vector.load %arg5[%c0_22, %c0_23] : memref<128x384xbf16, #tpu.memory_space<vmem>>, vector<128x384xbf16>
    %cst_24 = arith.constant dense<0.000000e+00> : vector<1x384xf32>
    %74 = tpu.matmul %72, %73, %cst_24 {dimension_numbers = #tpu.dot_dimension_numbers<[1], [0], [0], [1], [0, 0, 1, 1], [], []>} : vector<1x128xbf16>, vector<128x384xbf16>, vector<1x384xf32> -> vector<1x384xf32>
    %c0_25 = arith.constant 0 : index
    %c0_26 = arith.constant 0 : index
    %75 = vector.load %arg7[%c0_25, %c0_26] : memref<1x384xf32, #tpu.memory_space<vmem>>, vector<1x384xf32>
    %76 = arith.addf %74, %75 : vector<1x384xf32>
    %77 = vector.extract_strided_slice %71 {offsets = [0, 0], sizes = [1, 128], strides = [1, 1]} : vector<1x384xf32> to vector<1x128xf32>
    %78 = vector.extract_strided_slice %76 {offsets = [0, 0], sizes = [1, 128], strides = [1, 1]} : vector<1x384xf32> to vector<1x128xf32>
    %79 = arith.addf %77, %78 : vector<1x128xf32>
    %80 = arith.negf %79 : vector<1x128xf32>
    %81 = math.exp %80 : vector<1x128xf32>
    %cst_27 = arith.constant 1.000000e+00 : f32
    %82 = vector.broadcast %cst_27 : f32 to vector<1x128xf32>
    %83 = arith.addf %82, %81 : vector<1x128xf32>
    %84 = arith.divf %82, %83 : vector<1x128xf32>
    %85 = vector.extract_strided_slice %71 {offsets = [0, 128], sizes = [1, 128], strides = [1, 1]} : vector<1x384xf32> to vector<1x128xf32>
    %86 = vector.extract_strided_slice %76 {offsets = [0, 128], sizes = [1, 128], strides = [1, 1]} : vector<1x384xf32> to vector<1x128xf32>
    %87 = arith.addf %85, %86 : vector<1x128xf32>
    %88 = arith.negf %87 : vector<1x128xf32>
    %89 = math.exp %88 : vector<1x128xf32>
    %cst_28 = arith.constant 1.000000e+00 : f32
    %90 = vector.broadcast %cst_28 : f32 to vector<1x128xf32>
    %91 = arith.addf %90, %89 : vector<1x128xf32>
    %92 = arith.divf %90, %91 : vector<1x128xf32>
    %93 = vector.extract_strided_slice %71 {offsets = [0, 256], sizes = [1, 128], strides = [1, 1]} : vector<1x384xf32> to vector<1x128xf32>
    %94 = vector.extract_strided_slice %76 {offsets = [0, 256], sizes = [1, 128], strides = [1, 1]} : vector<1x384xf32> to vector<1x128xf32>
    %95 = arith.mulf %84, %94 : vector<1x128xf32>
    %96 = arith.addf %93, %95 : vector<1x128xf32>
    %97 = math.tanh %96 : vector<1x128xf32>
    %cst_29 = arith.constant 1.000000e+00 : f32
    %98 = vector.broadcast %cst_29 : f32 to vector<1x128xf32>
    %99 = arith.subf %98, %92 : vector<1x128xf32>
    %100 = arith.mulf %99, %97 : vector<1x128xf32>
    %101 = arith.mulf %92, %70 : vector<1x128xf32>
    %102 = arith.addf %100, %101 : vector<1x128xf32>
    %103 = vector.extract_strided_slice %5 {offsets = [3, 0], sizes = [1, 384], strides = [1, 1]} : vector<8x384xf32> to vector<1x384xf32>
    %104 = arith.truncf %102 : vector<1x128xf32> to vector<1x128xbf16>
    %c0_30 = arith.constant 0 : index
    %c0_31 = arith.constant 0 : index
    %105 = vector.load %arg5[%c0_30, %c0_31] : memref<128x384xbf16, #tpu.memory_space<vmem>>, vector<128x384xbf16>
    %cst_32 = arith.constant dense<0.000000e+00> : vector<1x384xf32>
    %106 = tpu.matmul %104, %105, %cst_32 {dimension_numbers = #tpu.dot_dimension_numbers<[1], [0], [0], [1], [0, 0, 1, 1], [], []>} : vector<1x128xbf16>, vector<128x384xbf16>, vector<1x384xf32> -> vector<1x384xf32>
    %c0_33 = arith.constant 0 : index
    %c0_34 = arith.constant 0 : index
    %107 = vector.load %arg7[%c0_33, %c0_34] : memref<1x384xf32, #tpu.memory_space<vmem>>, vector<1x384xf32>
    %108 = arith.addf %106, %107 : vector<1x384xf32>
    %109 = vector.extract_strided_slice %103 {offsets = [0, 0], sizes = [1, 128], strides = [1, 1]} : vector<1x384xf32> to vector<1x128xf32>
    %110 = vector.extract_strided_slice %108 {offsets = [0, 0], sizes = [1, 128], strides = [1, 1]} : vector<1x384xf32> to vector<1x128xf32>
    %111 = arith.addf %109, %110 : vector<1x128xf32>
    %112 = arith.negf %111 : vector<1x128xf32>
    %113 = math.exp %112 : vector<1x128xf32>
    %cst_35 = arith.constant 1.000000e+00 : f32
    %114 = vector.broadcast %cst_35 : f32 to vector<1x128xf32>
    %115 = arith.addf %114, %113 : vector<1x128xf32>
    %116 = arith.divf %114, %115 : vector<1x128xf32>
    %117 = vector.extract_strided_slice %103 {offsets = [0, 128], sizes = [1, 128], strides = [1, 1]} : vector<1x384xf32> to vector<1x128xf32>
    %118 = vector.extract_strided_slice %108 {offsets = [0, 128], sizes = [1, 128], strides = [1, 1]} : vector<1x384xf32> to vector<1x128xf32>
    %119 = arith.addf %117, %118 : vector<1x128xf32>
    %120 = arith.negf %119 : vector<1x128xf32>
    %121 = math.exp %120 : vector<1x128xf32>
    %cst_36 = arith.constant 1.000000e+00 : f32
    %122 = vector.broadcast %cst_36 : f32 to vector<1x128xf32>
    %123 = arith.addf %122, %121 : vector<1x128xf32>
    %124 = arith.divf %122, %123 : vector<1x128xf32>
    %125 = vector.extract_strided_slice %103 {offsets = [0, 256], sizes = [1, 128], strides = [1, 1]} : vector<1x384xf32> to vector<1x128xf32>
    %126 = vector.extract_strided_slice %108 {offsets = [0, 256], sizes = [1, 128], strides = [1, 1]} : vector<1x384xf32> to vector<1x128xf32>
    %127 = arith.mulf %116, %126 : vector<1x128xf32>
    %128 = arith.addf %125, %127 : vector<1x128xf32>
    %129 = math.tanh %128 : vector<1x128xf32>
    %cst_37 = arith.constant 1.000000e+00 : f32
    %130 = vector.broadcast %cst_37 : f32 to vector<1x128xf32>
    %131 = arith.subf %130, %124 : vector<1x128xf32>
    %132 = arith.mulf %131, %129 : vector<1x128xf32>
    %133 = arith.mulf %124, %102 : vector<1x128xf32>
    %134 = arith.addf %132, %133 : vector<1x128xf32>
    %135 = vector.extract_strided_slice %5 {offsets = [4, 0], sizes = [1, 384], strides = [1, 1]} : vector<8x384xf32> to vector<1x384xf32>
    %136 = arith.truncf %134 : vector<1x128xf32> to vector<1x128xbf16>
    %c0_38 = arith.constant 0 : index
    %c0_39 = arith.constant 0 : index
    %137 = vector.load %arg5[%c0_38, %c0_39] : memref<128x384xbf16, #tpu.memory_space<vmem>>, vector<128x384xbf16>
    %cst_40 = arith.constant dense<0.000000e+00> : vector<1x384xf32>
    %138 = tpu.matmul %136, %137, %cst_40 {dimension_numbers = #tpu.dot_dimension_numbers<[1], [0], [0], [1], [0, 0, 1, 1], [], []>} : vector<1x128xbf16>, vector<128x384xbf16>, vector<1x384xf32> -> vector<1x384xf32>
    %c0_41 = arith.constant 0 : index
    %c0_42 = arith.constant 0 : index
    %139 = vector.load %arg7[%c0_41, %c0_42] : memref<1x384xf32, #tpu.memory_space<vmem>>, vector<1x384xf32>
    %140 = arith.addf %138, %139 : vector<1x384xf32>
    %141 = vector.extract_strided_slice %135 {offsets = [0, 0], sizes = [1, 128], strides = [1, 1]} : vector<1x384xf32> to vector<1x128xf32>
    %142 = vector.extract_strided_slice %140 {offsets = [0, 0], sizes = [1, 128], strides = [1, 1]} : vector<1x384xf32> to vector<1x128xf32>
    %143 = arith.addf %141, %142 : vector<1x128xf32>
    %144 = arith.negf %143 : vector<1x128xf32>
    %145 = math.exp %144 : vector<1x128xf32>
    %cst_43 = arith.constant 1.000000e+00 : f32
    %146 = vector.broadcast %cst_43 : f32 to vector<1x128xf32>
    %147 = arith.addf %146, %145 : vector<1x128xf32>
    %148 = arith.divf %146, %147 : vector<1x128xf32>
    %149 = vector.extract_strided_slice %135 {offsets = [0, 128], sizes = [1, 128], strides = [1, 1]} : vector<1x384xf32> to vector<1x128xf32>
    %150 = vector.extract_strided_slice %140 {offsets = [0, 128], sizes = [1, 128], strides = [1, 1]} : vector<1x384xf32> to vector<1x128xf32>
    %151 = arith.addf %149, %150 : vector<1x128xf32>
    %152 = arith.negf %151 : vector<1x128xf32>
    %153 = math.exp %152 : vector<1x128xf32>
    %cst_44 = arith.constant 1.000000e+00 : f32
    %154 = vector.broadcast %cst_44 : f32 to vector<1x128xf32>
    %155 = arith.addf %154, %153 : vector<1x128xf32>
    %156 = arith.divf %154, %155 : vector<1x128xf32>
    %157 = vector.extract_strided_slice %135 {offsets = [0, 256], sizes = [1, 128], strides = [1, 1]} : vector<1x384xf32> to vector<1x128xf32>
    %158 = vector.extract_strided_slice %140 {offsets = [0, 256], sizes = [1, 128], strides = [1, 1]} : vector<1x384xf32> to vector<1x128xf32>
    %159 = arith.mulf %148, %158 : vector<1x128xf32>
    %160 = arith.addf %157, %159 : vector<1x128xf32>
    %161 = math.tanh %160 : vector<1x128xf32>
    %cst_45 = arith.constant 1.000000e+00 : f32
    %162 = vector.broadcast %cst_45 : f32 to vector<1x128xf32>
    %163 = arith.subf %162, %156 : vector<1x128xf32>
    %164 = arith.mulf %163, %161 : vector<1x128xf32>
    %165 = arith.mulf %156, %134 : vector<1x128xf32>
    %166 = arith.addf %164, %165 : vector<1x128xf32>
    %167 = vector.extract_strided_slice %5 {offsets = [5, 0], sizes = [1, 384], strides = [1, 1]} : vector<8x384xf32> to vector<1x384xf32>
    %168 = arith.truncf %166 : vector<1x128xf32> to vector<1x128xbf16>
    %c0_46 = arith.constant 0 : index
    %c0_47 = arith.constant 0 : index
    %169 = vector.load %arg5[%c0_46, %c0_47] : memref<128x384xbf16, #tpu.memory_space<vmem>>, vector<128x384xbf16>
    %cst_48 = arith.constant dense<0.000000e+00> : vector<1x384xf32>
    %170 = tpu.matmul %168, %169, %cst_48 {dimension_numbers = #tpu.dot_dimension_numbers<[1], [0], [0], [1], [0, 0, 1, 1], [], []>} : vector<1x128xbf16>, vector<128x384xbf16>, vector<1x384xf32> -> vector<1x384xf32>
    %c0_49 = arith.constant 0 : index
    %c0_50 = arith.constant 0 : index
    %171 = vector.load %arg7[%c0_49, %c0_50] : memref<1x384xf32, #tpu.memory_space<vmem>>, vector<1x384xf32>
    %172 = arith.addf %170, %171 : vector<1x384xf32>
    %173 = vector.extract_strided_slice %167 {offsets = [0, 0], sizes = [1, 128], strides = [1, 1]} : vector<1x384xf32> to vector<1x128xf32>
    %174 = vector.extract_strided_slice %172 {offsets = [0, 0], sizes = [1, 128], strides = [1, 1]} : vector<1x384xf32> to vector<1x128xf32>
    %175 = arith.addf %173, %174 : vector<1x128xf32>
    %176 = arith.negf %175 : vector<1x128xf32>
    %177 = math.exp %176 : vector<1x128xf32>
    %cst_51 = arith.constant 1.000000e+00 : f32
    %178 = vector.broadcast %cst_51 : f32 to vector<1x128xf32>
    %179 = arith.addf %178, %177 : vector<1x128xf32>
    %180 = arith.divf %178, %179 : vector<1x128xf32>
    %181 = vector.extract_strided_slice %167 {offsets = [0, 128], sizes = [1, 128], strides = [1, 1]} : vector<1x384xf32> to vector<1x128xf32>
    %182 = vector.extract_strided_slice %172 {offsets = [0, 128], sizes = [1, 128], strides = [1, 1]} : vector<1x384xf32> to vector<1x128xf32>
    %183 = arith.addf %181, %182 : vector<1x128xf32>
    %184 = arith.negf %183 : vector<1x128xf32>
    %185 = math.exp %184 : vector<1x128xf32>
    %cst_52 = arith.constant 1.000000e+00 : f32
    %186 = vector.broadcast %cst_52 : f32 to vector<1x128xf32>
    %187 = arith.addf %186, %185 : vector<1x128xf32>
    %188 = arith.divf %186, %187 : vector<1x128xf32>
    %189 = vector.extract_strided_slice %167 {offsets = [0, 256], sizes = [1, 128], strides = [1, 1]} : vector<1x384xf32> to vector<1x128xf32>
    %190 = vector.extract_strided_slice %172 {offsets = [0, 256], sizes = [1, 128], strides = [1, 1]} : vector<1x384xf32> to vector<1x128xf32>
    %191 = arith.mulf %180, %190 : vector<1x128xf32>
    %192 = arith.addf %189, %191 : vector<1x128xf32>
    %193 = math.tanh %192 : vector<1x128xf32>
    %cst_53 = arith.constant 1.000000e+00 : f32
    %194 = vector.broadcast %cst_53 : f32 to vector<1x128xf32>
    %195 = arith.subf %194, %188 : vector<1x128xf32>
    %196 = arith.mulf %195, %193 : vector<1x128xf32>
    %197 = arith.mulf %188, %166 : vector<1x128xf32>
    %198 = arith.addf %196, %197 : vector<1x128xf32>
    %199 = vector.extract_strided_slice %5 {offsets = [6, 0], sizes = [1, 384], strides = [1, 1]} : vector<8x384xf32> to vector<1x384xf32>
    %200 = arith.truncf %198 : vector<1x128xf32> to vector<1x128xbf16>
    %c0_54 = arith.constant 0 : index
    %c0_55 = arith.constant 0 : index
    %201 = vector.load %arg5[%c0_54, %c0_55] : memref<128x384xbf16, #tpu.memory_space<vmem>>, vector<128x384xbf16>
    %cst_56 = arith.constant dense<0.000000e+00> : vector<1x384xf32>
    %202 = tpu.matmul %200, %201, %cst_56 {dimension_numbers = #tpu.dot_dimension_numbers<[1], [0], [0], [1], [0, 0, 1, 1], [], []>} : vector<1x128xbf16>, vector<128x384xbf16>, vector<1x384xf32> -> vector<1x384xf32>
    %c0_57 = arith.constant 0 : index
    %c0_58 = arith.constant 0 : index
    %203 = vector.load %arg7[%c0_57, %c0_58] : memref<1x384xf32, #tpu.memory_space<vmem>>, vector<1x384xf32>
    %204 = arith.addf %202, %203 : vector<1x384xf32>
    %205 = vector.extract_strided_slice %199 {offsets = [0, 0], sizes = [1, 128], strides = [1, 1]} : vector<1x384xf32> to vector<1x128xf32>
    %206 = vector.extract_strided_slice %204 {offsets = [0, 0], sizes = [1, 128], strides = [1, 1]} : vector<1x384xf32> to vector<1x128xf32>
    %207 = arith.addf %205, %206 : vector<1x128xf32>
    %208 = arith.negf %207 : vector<1x128xf32>
    %209 = math.exp %208 : vector<1x128xf32>
    %cst_59 = arith.constant 1.000000e+00 : f32
    %210 = vector.broadcast %cst_59 : f32 to vector<1x128xf32>
    %211 = arith.addf %210, %209 : vector<1x128xf32>
    %212 = arith.divf %210, %211 : vector<1x128xf32>
    %213 = vector.extract_strided_slice %199 {offsets = [0, 128], sizes = [1, 128], strides = [1, 1]} : vector<1x384xf32> to vector<1x128xf32>
    %214 = vector.extract_strided_slice %204 {offsets = [0, 128], sizes = [1, 128], strides = [1, 1]} : vector<1x384xf32> to vector<1x128xf32>
    %215 = arith.addf %213, %214 : vector<1x128xf32>
    %216 = arith.negf %215 : vector<1x128xf32>
    %217 = math.exp %216 : vector<1x128xf32>
    %cst_60 = arith.constant 1.000000e+00 : f32
    %218 = vector.broadcast %cst_60 : f32 to vector<1x128xf32>
    %219 = arith.addf %218, %217 : vector<1x128xf32>
    %220 = arith.divf %218, %219 : vector<1x128xf32>
    %221 = vector.extract_strided_slice %199 {offsets = [0, 256], sizes = [1, 128], strides = [1, 1]} : vector<1x384xf32> to vector<1x128xf32>
    %222 = vector.extract_strided_slice %204 {offsets = [0, 256], sizes = [1, 128], strides = [1, 1]} : vector<1x384xf32> to vector<1x128xf32>
    %223 = arith.mulf %212, %222 : vector<1x128xf32>
    %224 = arith.addf %221, %223 : vector<1x128xf32>
    %225 = math.tanh %224 : vector<1x128xf32>
    %cst_61 = arith.constant 1.000000e+00 : f32
    %226 = vector.broadcast %cst_61 : f32 to vector<1x128xf32>
    %227 = arith.subf %226, %220 : vector<1x128xf32>
    %228 = arith.mulf %227, %225 : vector<1x128xf32>
    %229 = arith.mulf %220, %198 : vector<1x128xf32>
    %230 = arith.addf %228, %229 : vector<1x128xf32>
    %231 = vector.extract_strided_slice %5 {offsets = [7, 0], sizes = [1, 384], strides = [1, 1]} : vector<8x384xf32> to vector<1x384xf32>
    %232 = arith.truncf %230 : vector<1x128xf32> to vector<1x128xbf16>
    %c0_62 = arith.constant 0 : index
    %c0_63 = arith.constant 0 : index
    %233 = vector.load %arg5[%c0_62, %c0_63] : memref<128x384xbf16, #tpu.memory_space<vmem>>, vector<128x384xbf16>
    %cst_64 = arith.constant dense<0.000000e+00> : vector<1x384xf32>
    %234 = tpu.matmul %232, %233, %cst_64 {dimension_numbers = #tpu.dot_dimension_numbers<[1], [0], [0], [1], [0, 0, 1, 1], [], []>} : vector<1x128xbf16>, vector<128x384xbf16>, vector<1x384xf32> -> vector<1x384xf32>
    %c0_65 = arith.constant 0 : index
    %c0_66 = arith.constant 0 : index
    %235 = vector.load %arg7[%c0_65, %c0_66] : memref<1x384xf32, #tpu.memory_space<vmem>>, vector<1x384xf32>
    %236 = arith.addf %234, %235 : vector<1x384xf32>
    %237 = vector.extract_strided_slice %231 {offsets = [0, 0], sizes = [1, 128], strides = [1, 1]} : vector<1x384xf32> to vector<1x128xf32>
    %238 = vector.extract_strided_slice %236 {offsets = [0, 0], sizes = [1, 128], strides = [1, 1]} : vector<1x384xf32> to vector<1x128xf32>
    %239 = arith.addf %237, %238 : vector<1x128xf32>
    %240 = arith.negf %239 : vector<1x128xf32>
    %241 = math.exp %240 : vector<1x128xf32>
    %cst_67 = arith.constant 1.000000e+00 : f32
    %242 = vector.broadcast %cst_67 : f32 to vector<1x128xf32>
    %243 = arith.addf %242, %241 : vector<1x128xf32>
    %244 = arith.divf %242, %243 : vector<1x128xf32>
    %245 = vector.extract_strided_slice %231 {offsets = [0, 128], sizes = [1, 128], strides = [1, 1]} : vector<1x384xf32> to vector<1x128xf32>
    %246 = vector.extract_strided_slice %236 {offsets = [0, 128], sizes = [1, 128], strides = [1, 1]} : vector<1x384xf32> to vector<1x128xf32>
    %247 = arith.addf %245, %246 : vector<1x128xf32>
    %248 = arith.negf %247 : vector<1x128xf32>
    %249 = math.exp %248 : vector<1x128xf32>
    %cst_68 = arith.constant 1.000000e+00 : f32
    %250 = vector.broadcast %cst_68 : f32 to vector<1x128xf32>
    %251 = arith.addf %250, %249 : vector<1x128xf32>
    %252 = arith.divf %250, %251 : vector<1x128xf32>
    %253 = vector.extract_strided_slice %231 {offsets = [0, 256], sizes = [1, 128], strides = [1, 1]} : vector<1x384xf32> to vector<1x128xf32>
    %254 = vector.extract_strided_slice %236 {offsets = [0, 256], sizes = [1, 128], strides = [1, 1]} : vector<1x384xf32> to vector<1x128xf32>
    %255 = arith.mulf %244, %254 : vector<1x128xf32>
    %256 = arith.addf %253, %255 : vector<1x128xf32>
    %257 = math.tanh %256 : vector<1x128xf32>
    %cst_69 = arith.constant 1.000000e+00 : f32
    %258 = vector.broadcast %cst_69 : f32 to vector<1x128xf32>
    %259 = arith.subf %258, %252 : vector<1x128xf32>
    %260 = arith.mulf %259, %257 : vector<1x128xf32>
    %261 = arith.mulf %252, %230 : vector<1x128xf32>
    %262 = arith.addf %260, %261 : vector<1x128xf32>
    %263 = tpu.concatenate %38, %70, %102, %134, %166, %198, %230, %262 in 0 : vector<1x128xf32>, vector<1x128xf32>, vector<1x128xf32>, vector<1x128xf32>, vector<1x128xf32>, vector<1x128xf32>, vector<1x128xf32>, vector<1x128xf32> -> vector<8x128xf32>
    %cst_70 = arith.constant dense<0.000000e+00> : vector<128xf32>
    %264 = vector.multi_reduction <add>, %263, %cst_70 [0] : vector<8x128xf32> to vector<128xf32>
    %265 = vector.shape_cast %264 : vector<128xf32> to vector<1x128xf32>
    %cst_71 = arith.constant 8.000000e+00 : f32
    %266 = vector.broadcast %cst_71 : f32 to vector<1x128xf32>
    %267 = arith.divf %265, %266 : vector<1x128xf32>
    %268 = tpu.iota {dimensions = array<i32: 1>} : vector<1x128xi32>
    %269 = arith.sitofp %268 : vector<1x128xi32> to vector<1x128xf32>
    %c0_i32 = arith.constant 0 : i32
    %270 = vector.broadcast %c0_i32 : i32 to vector<1x128xi32>
    %271 = arith.cmpi eq, %268, %270 : vector<1x128xi32>
    %c127_i32 = arith.constant 127 : i32
    %272 = vector.broadcast %c127_i32 : i32 to vector<1x128xi32>
    %273 = arith.cmpi eq, %268, %272 : vector<1x128xi32>
    %274 = arith.extui %273 : vector<1x128xi1> to vector<1x128xi32>
    %275 = arith.sitofp %274 : vector<1x128xi32> to vector<1x128xf32>
    %c1 = arith.constant 1 : index
    %c0_72 = arith.constant 0 : index
    %276 = vector.load %arg2[%c1, %c0_72] : memref<128x128xbf16, #tpu.memory_space<vmem>>, vector<1x128xbf16>
    %c0_i32_73 = arith.constant 0 : i32
    %c8_i32 = arith.constant 8 : i32
    %277 = arith.addi %c0_i32_73, %c8_i32 : i32
    %c1_i32 = arith.constant 1 : i32
    %278:2 = scf.for %arg17 = %c0_i32_73 to %277 step %c1_i32 iter_args(%arg18 = %276, %arg19 = %262) -> (vector<1x128xbf16>, vector<1x128xf32>)  : i32 {
      %c0_75 = arith.constant 0 : index
      %c0_76 = arith.constant 0 : index
      %279 = vector.load %arg8[%c0_75, %c0_76] : memref<128x384xbf16, #tpu.memory_space<vmem>>, vector<128x384xbf16>
      %cst_77 = arith.constant dense<0.000000e+00> : vector<1x384xf32>
      %280 = tpu.matmul %arg18, %279, %cst_77 {dimension_numbers = #tpu.dot_dimension_numbers<[1], [0], [0], [1], [0, 0, 1, 1], [], []>} : vector<1x128xbf16>, vector<128x384xbf16>, vector<1x384xf32> -> vector<1x384xf32>
      %c0_78 = arith.constant 0 : index
      %c0_79 = arith.constant 0 : index
      %281 = vector.load %arg10[%c0_78, %c0_79] : memref<1x384xf32, #tpu.memory_space<vmem>>, vector<1x384xf32>
      %282 = arith.addf %280, %281 : vector<1x384xf32>
      %283 = arith.truncf %arg19 : vector<1x128xf32> to vector<1x128xbf16>
      %c0_80 = arith.constant 0 : index
      %c0_81 = arith.constant 0 : index
      %284 = vector.load %arg9[%c0_80, %c0_81] : memref<128x384xbf16, #tpu.memory_space<vmem>>, vector<128x384xbf16>
      %cst_82 = arith.constant dense<0.000000e+00> : vector<1x384xf32>
      %285 = tpu.matmul %283, %284, %cst_82 {dimension_numbers = #tpu.dot_dimension_numbers<[1], [0], [0], [1], [0, 0, 1, 1], [], []>} : vector<1x128xbf16>, vector<128x384xbf16>, vector<1x384xf32> -> vector<1x384xf32>
      %c0_83 = arith.constant 0 : index
      %c0_84 = arith.constant 0 : index
      %286 = vector.load %arg11[%c0_83, %c0_84] : memref<1x384xf32, #tpu.memory_space<vmem>>, vector<1x384xf32>
      %287 = arith.addf %285, %286 : vector<1x384xf32>
      %288 = vector.extract_strided_slice %282 {offsets = [0, 0], sizes = [1, 128], strides = [1, 1]} : vector<1x384xf32> to vector<1x128xf32>
      %289 = vector.extract_strided_slice %287 {offsets = [0, 0], sizes = [1, 128], strides = [1, 1]} : vector<1x384xf32> to vector<1x128xf32>
      %290 = arith.addf %288, %289 : vector<1x128xf32>
      %291 = arith.negf %290 : vector<1x128xf32>
      %292 = math.exp %291 : vector<1x128xf32>
      %cst_85 = arith.constant 1.000000e+00 : f32
      %293 = vector.broadcast %cst_85 : f32 to vector<1x128xf32>
      %294 = arith.addf %293, %292 : vector<1x128xf32>
      %295 = arith.divf %293, %294 : vector<1x128xf32>
      %296 = vector.extract_strided_slice %282 {offsets = [0, 128], sizes = [1, 128], strides = [1, 1]} : vector<1x384xf32> to vector<1x128xf32>
      %297 = vector.extract_strided_slice %287 {offsets = [0, 128], sizes = [1, 128], strides = [1, 1]} : vector<1x384xf32> to vector<1x128xf32>
      %298 = arith.addf %296, %297 : vector<1x128xf32>
      %299 = arith.negf %298 : vector<1x128xf32>
      %300 = math.exp %299 : vector<1x128xf32>
      %cst_86 = arith.constant 1.000000e+00 : f32
      %301 = vector.broadcast %cst_86 : f32 to vector<1x128xf32>
      %302 = arith.addf %301, %300 : vector<1x128xf32>
      %303 = arith.divf %301, %302 : vector<1x128xf32>
      %304 = vector.extract_strided_slice %282 {offsets = [0, 256], sizes = [1, 128], strides = [1, 1]} : vector<1x384xf32> to vector<1x128xf32>
      %305 = vector.extract_strided_slice %287 {offsets = [0, 256], sizes = [1, 128], strides = [1, 1]} : vector<1x384xf32> to vector<1x128xf32>
      %306 = arith.mulf %295, %305 : vector<1x128xf32>
      %307 = arith.addf %304, %306 : vector<1x128xf32>
      %308 = math.tanh %307 : vector<1x128xf32>
      %cst_87 = arith.constant 1.000000e+00 : f32
      %309 = vector.broadcast %cst_87 : f32 to vector<1x128xf32>
      %310 = arith.subf %309, %303 : vector<1x128xf32>
      %311 = arith.mulf %310, %308 : vector<1x128xf32>
      %312 = arith.mulf %303, %arg19 : vector<1x128xf32>
      %313 = arith.addf %311, %312 : vector<1x128xf32>
      %cst_88 = arith.constant dense<0.000000e+00> : vector<1x8xf32>
      %314 = tpu.matmul %313, %263, %cst_88 {dimension_numbers = #tpu.dot_dimension_numbers<[1], [1], [0], [0], [0, 0, 1, 0], [], []>} : vector<1x128xf32>, vector<8x128xf32>, vector<1x8xf32> -> vector<1x8xf32>
      %cst_89 = arith.constant dense<0xFF800000> : vector<1xf32>
      %315 = vector.multi_reduction <maximumf>, %314, %cst_89 [1] : vector<1x8xf32> to vector<1xf32>
      %316 = vector.shape_cast %315 : vector<1xf32> to vector<1x1xf32>
      %317 = vector.broadcast %316 : vector<1x1xf32> to vector<1x8xf32>
      %318 = arith.subf %314, %317 : vector<1x8xf32>
      %319 = math.exp %318 : vector<1x8xf32>
      %cst_90 = arith.constant dense<0.000000e+00> : vector<1xf32>
      %320 = vector.multi_reduction <add>, %319, %cst_90 [1] : vector<1x8xf32> to vector<1xf32>
      %321 = vector.shape_cast %320 : vector<1xf32> to vector<1x1xf32>
      %322 = tpu.reciprocal %321 {approx = true} : vector<1x1xf32> -> vector<1x1xf32>
      %323 = vector.broadcast %322 : vector<1x1xf32> to vector<1x8xf32>
      %324 = arith.mulf %319, %323 : vector<1x8xf32>
      %cst_91 = arith.constant dense<0.000000e+00> : vector<1x128xf32>
      %325 = tpu.matmul %324, %263, %cst_91 {dimension_numbers = #tpu.dot_dimension_numbers<[1], [0], [0], [1], [0, 0, 1, 1], [], []>} : vector<1x8xf32>, vector<8x128xf32>, vector<1x128xf32> -> vector<1x128xf32>
      %326 = arith.addf %325, %267 : vector<1x128xf32>
      %327 = arith.truncf %313 : vector<1x128xf32> to vector<1x128xbf16>
      %c0_92 = arith.constant 0 : index
      %c0_93 = arith.constant 0 : index
      %328 = vector.load %arg12[%c0_92, %c0_93] : memref<256x128xbf16, #tpu.memory_space<vmem>>, vector<128x128xbf16>
      %cst_94 = arith.constant dense<0.000000e+00> : vector<1x128xf32>
      %329 = tpu.matmul %327, %328, %cst_94 {dimension_numbers = #tpu.dot_dimension_numbers<[1], [0], [0], [1], [0, 0, 1, 1], [], []>} : vector<1x128xbf16>, vector<128x128xbf16>, vector<1x128xf32> -> vector<1x128xf32>
      %330 = arith.truncf %326 : vector<1x128xf32> to vector<1x128xbf16>
      %c128 = arith.constant 128 : index
      %c0_95 = arith.constant 0 : index
      %331 = vector.load %arg12[%c128, %c0_95] : memref<256x128xbf16, #tpu.memory_space<vmem>>, vector<128x128xbf16>
      %cst_96 = arith.constant dense<0.000000e+00> : vector<1x128xf32>
      %332 = tpu.matmul %330, %331, %cst_96 {dimension_numbers = #tpu.dot_dimension_numbers<[1], [0], [0], [1], [0, 0, 1, 1], [], []>} : vector<1x128xbf16>, vector<128x128xbf16>, vector<1x128xf32> -> vector<1x128xf32>
      %333 = arith.addf %329, %332 : vector<1x128xf32>
      %334 = math.tanh %333 : vector<1x128xf32>
      %335 = arith.truncf %334 : vector<1x128xf32> to vector<1x128xbf16>
      %c0_97 = arith.constant 0 : index
      %c0_98 = arith.constant 0 : index
      %336 = vector.load %arg13[%c0_97, %c0_98] : memref<128x128xbf16, #tpu.memory_space<vmem>>, vector<128x128xbf16>
      %cst_99 = arith.constant dense<0.000000e+00> : vector<1x128xf32>
      %337 = tpu.matmul %335, %336, %cst_99 {dimension_numbers = #tpu.dot_dimension_numbers<[1], [0], [0], [1], [0, 0, 1, 1], [], []>} : vector<1x128xbf16>, vector<128x128xbf16>, vector<1x128xf32> -> vector<1x128xf32>
      %c0_100 = arith.constant 0 : index
      %c0_101 = arith.constant 0 : index
      %338 = vector.load %arg14[%c0_100, %c0_101] : memref<1x128xf32, #tpu.memory_space<vmem>>, vector<1x128xf32>
      %339 = arith.addf %337, %338 : vector<1x128xf32>
      %cst_102 = arith.constant dense<0xFF800000> : vector<1xf32>
      %340 = vector.multi_reduction <maximumf>, %339, %cst_102 [1] : vector<1x128xf32> to vector<1xf32>
      %341 = vector.shape_cast %340 : vector<1xf32> to vector<1x1xf32>
      %342 = vector.broadcast %341 : vector<1x1xf32> to vector<1x128xf32>
      %343 = arith.subf %339, %342 : vector<1x128xf32>
      %344 = math.exp %343 : vector<1x128xf32>
      %cst_103 = arith.constant dense<0.000000e+00> : vector<1xf32>
      %345 = vector.multi_reduction <add>, %344, %cst_103 [1] : vector<1x128xf32> to vector<1xf32>
      %346 = vector.shape_cast %345 : vector<1xf32> to vector<1x1xf32>
      %347 = vector.broadcast %346 : vector<1x1xf32> to vector<1x128xf32>
      %348 = arith.divf %344, %347 : vector<1x128xf32>
      %c0_104 = arith.constant 0 : index
      %c0_105 = arith.constant 0 : index
      %349 = vector.load %arg3[%c0_104, %c0_105] : memref<128x128xf32, #tpu.memory_space<vmem>>, vector<128x128xf32>
      %cst_106 = arith.constant dense<0.000000e+00> : vector<1x128xf32>
      %350 = tpu.matmul %348, %349, %cst_106 {dimension_numbers = #tpu.dot_dimension_numbers<[1], [0], [0], [1], [0, 0, 1, 1], [], []>} : vector<1x128xf32>, vector<128x128xf32>, vector<1x128xf32> -> vector<1x128xf32>
      %351 = arith.index_cast %arg17 : i32 to index
      %352 = memref.load %arg0[%351] : memref<8xf32, #tpu.memory_space<smem>>
      %353 = vector.broadcast %352 : f32 to vector<1x128xf32>
      %354 = arith.cmpf ogt, %350, %353 : vector<1x128xf32>
      %355 = arith.extui %354 : vector<1x128xi1> to vector<1x128xi32>
      %356 = arith.sitofp %355 : vector<1x128xi32> to vector<1x128xf32>
      %357 = arith.maximumf %356, %275 : vector<1x128xf32>
      %c1_i32_107 = arith.constant 1 : i32
      %358 = tpu.dynamic_rotate %357 by %c1_i32_107 dim 1 : vector<1x128xf32>, i32 -> vector<1x128xf32>
      %cst_108 = arith.constant 0.000000e+00 : f32
      %359 = vector.broadcast %cst_108 : f32 to vector<1x128xf32>
      %360 = arith.select %271, %359, %358 : vector<1x128xi1>, vector<1x128xf32>
      %cst_109 = arith.constant 1.000000e+00 : f32
      %361 = vector.broadcast %cst_109 : f32 to vector<1x128xf32>
      %362 = arith.subf %361, %360 : vector<1x128xf32>
      %363 = arith.mulf %357, %362 : vector<1x128xf32>
      %364 = arith.truncf %363 : vector<1x128xf32> to vector<1x128xbf16>
      %c0_110 = arith.constant 0 : index
      %c0_111 = arith.constant 0 : index
      %365 = vector.load %arg2[%c0_110, %c0_111] : memref<128x128xbf16, #tpu.memory_space<vmem>>, vector<128x128xbf16>
      %cst_112 = arith.constant dense<0.000000e+00> : vector<1x128xf32>
      %366 = tpu.matmul %364, %365, %cst_112 {dimension_numbers = #tpu.dot_dimension_numbers<[1], [0], [0], [1], [0, 0, 1, 1], [], []>} : vector<1x128xbf16>, vector<128x128xbf16>, vector<1x128xf32> -> vector<1x128xf32>
      %367 = arith.truncf %366 : vector<1x128xf32> to vector<1x128xbf16>
      %368 = arith.mulf %363, %269 : vector<1x128xf32>
      %369 = vector.shape_cast %368 : vector<1x128xf32> to vector<1x1x128xf32>
      %cst_113 = arith.constant dense<0.000000e+00> : vector<1xf32>
      %370 = vector.multi_reduction <add>, %369, %cst_113 [1, 2] : vector<1x1x128xf32> to vector<1xf32>
      %371 = vector.shape_cast %370 : vector<1xf32> to vector<1x1x1xf32>
      %372 = vector.extract %371[0, 0, 0] : f32 from vector<1x1x1xf32>
      %373 = arith.fptosi %372 : f32 to i32
      %374 = arith.mulf %363, %348 : vector<1x128xf32>
      %375 = vector.shape_cast %374 : vector<1x128xf32> to vector<1x1x128xf32>
      %cst_114 = arith.constant dense<0.000000e+00> : vector<1xf32>
      %376 = vector.multi_reduction <add>, %375, %cst_114 [1, 2] : vector<1x1x128xf32> to vector<1xf32>
      %377 = vector.shape_cast %376 : vector<1xf32> to vector<1x1x1xf32>
      %378 = vector.extract %377[0, 0, 0] : f32 from vector<1x1x1xf32>
      %379 = arith.index_cast %arg17 : i32 to index
      %380 = memref.load %arg15[%379] : memref<8xi32, #tpu.memory_space<smem>>
      memref.store %373, %arg15[%379] : memref<8xi32, #tpu.memory_space<smem>>
      %381 = arith.index_cast %arg17 : i32 to index
      %382 = memref.load %arg16[%381] : memref<8xf32, #tpu.memory_space<smem>>
      memref.store %378, %arg16[%381] : memref<8xf32, #tpu.memory_space<smem>>
      scf.yield %367, %313 : vector<1x128xbf16>, vector<1x128xf32>
    }
    %c8_i32_74 = arith.constant 8 : i32
    return
  }
}

</mosaic_0001>

<bundles_post_ra>
// kernel: probability_search_decode.1
= control target key start
LH: loop header
LB: loop body
LE: loop exit
PB: predicated region body
PF: predicated region fallthrough
CT: control target
= control target key end

     0   :  { %s5158_s0 = inlined_call_operand.vmem [shape: f32[8], index: 0, kind: input, shape index: {}]   ;;  %s5159_s1 = inlined_call_operand.vmem [shape: bf16[8,128], index: 1, kind: input, shape index: {}]   ;;  %s5160_s2 = inlined_call_operand.vmem [shape: bf16[128,128], index: 2, kind: input, shape index: {}]   ;;  %s5161_s3 = inlined_call_operand.vmem [shape: f32[128,128], index: 3, kind: input, shape index: {}]   ;;  %s5162_s4 = inlined_call_operand.vmem [shape: bf16[128,384], index: 4, kind: input, shape index: {}]   ;;  %s5163_s5 = inlined_call_operand.hbm [shape: bf16[128,384], index: 5, kind: input, shape index: {}]   ;;  %s5164_s6 = inlined_call_operand.vmem [shape: f32[1,384], index: 6, kind: input, shape index: {}]   ;;  %s5165_s7 = inlined_call_operand.vmem [shape: f32[1,384], index: 7, kind: input, shape index: {}]   ;;  %s5166_s8 = inlined_call_operand.hbm [shape: bf16[128,384], index: 8, kind: input, shape index: {}]   ;;  %s5167_s9 = inlined_call_operand.hbm [shape: bf16[128,384], index: 9, kind: input, shape index: {}]   ;;  %s5168_s10 = inlined_call_operand.hbm [shape: f32[1,384], index: 10, kind: input, shape index: {}]   ;;  %s5169_s11 = inlined_call_operand.hbm [shape: f32[1,384], index: 11, kind: input, shape index: {}]   ;;  %s5170_s12 = inlined_call_operand.hbm [shape: bf16[256,128], index: 12, kind: input, shape index: {}]   ;;  %s5171_s13 = inlined_call_operand.hbm [shape: bf16[128,128], index: 13, kind: input, shape index: {}]   ;;  %s5172_s14 = inlined_call_operand.hbm [shape: f32[1,128], index: 14, kind: input, shape index: {}]   ;;  %s5173_s15 = inlined_call_operand.hbm [shape: s32[8], index: 15, kind: output, shape index: {0}]   ;;  %s5174_s16 = inlined_call_operand.hbm [shape: f32[8], index: 16, kind: output, shape index: {1}]  }
   0x1   :  { %5179 = sst [smem:[#allocation29_spill]] %s5158_s0 }
   0x2   :  { %22 = vsyncpa [#allocation5], 0 }
   0x3   :  { %23 = vsyncpa [#allocation3], 0 }
   0x4   :  { %24 = vsyncpa [#allocation8], 0 }
   0x5   :  { %25 = vsyncpa [#allocation11], 0 }
   0x6   :  { %26 = vsyncpa [#allocation14], 0 }
   0x7   :  { %27 = vsyncpa [#allocation17], 0 }
   0x8   :  { %28 = vsyncpa [#allocation4], 0 }
   0x9   :  { %29 = vsyncpa [#allocation20], 0  ;;  %s4157_s21 = smov [#allocation7]   ;;  %s4158_s23 = smov [#allocation10]  }
   0xa   :  { %s69_s22 = sshll.u32 %s4157_s21, 4  ;;  %s94_s24 = sshll.u32 %s4158_s23, 4  ;;  %s70_s22 = int_to_ptr.vmem [resolvable:$true] %s69_s22  ;;  %s4265_s24 = int_to_ptr.vmem [resolvable:$true] %s94_s24 }
   0xb   :  { %s3909_s27 = scalar_lea.hbm %s5166_s8, 3072 }
   0xc   :  { %p3910_p0 = scmp.ne.s32.totalorder %s5166_s8, %s3909_s27  ;;  %p3913_p1 = scmp.lt.u32.totalorder %s3909_s27, %s5166_s8 }
   0xe   :  { %p3915_p2 = pnand %p3913_p1, %p3910_p0 }
  0x10   :  { %3918 = shalt.err (!%p3915_p2)
}
  0x11   :  { %s3919_s17 = scalar_lea.vmem %s70_s22, 3072  ;;  %p3924_p4 = scmp.lt.s32.totalorder %s70_s22, %s70_s22 }
  0x12   :  { %p3920_p3 = scmp.ne.s32.totalorder %s70_s22, %s3919_s17  ;;  %p3925_p5 = scmp.lt.s32.totalorder %s3919_s17, %s3919_s17 }
  0x14   :  { %p3926_p6 = por %p3925_p5, %p3924_p4 }
  0x16   :  { %p3927_p7 = pnand %p3926_p6, %p3920_p3 }
  0x18   :  { %3930 = shalt.err (!%p3927_p7)
}
  0x19   :  { %s5175_s18 = smov 192   ;;  %s5177_s19 = smov 12  }
  0x1a   :  { %75 = dma.hbm_to_vmem [thread:$0]  %s5166_s8, 3072, %s70_s22, [#allocation8], %s5175_s18, %s5175_s18, %s5177_s19  }
  0x1b   :  { %s3931_s26 = scalar_lea.hbm %s5168_s10, 48 }
  0x1c   :  { %p3932_p8 = scmp.ne.s32.totalorder %s5168_s10, %s3931_s26  ;;  %p3935_p9 = scmp.lt.u32.totalorder %s3931_s26, %s5168_s10 }
  0x1e   :  { %p3937_p10 = pnand %p3935_p9, %p3932_p8 }
  0x20   :  { %3940 = shalt.err (!%p3937_p10)
}
  0x21   :  { %s3941_s0 = scalar_lea.vmem %s4265_s24, 48  ;;  %s3945_s8 = scalar_lea.vmem %s4265_s24, 64 }
  0x22   :  { %p3942_p11 = scmp.ne.s32.totalorder %s4265_s24, %s3941_s0  ;;  %p3946_p12 = scmp.lt.s32.totalorder %s4265_s24, %s4265_s24 }
  0x23   :  { %p3947_p13 = scmp.lt.s32.totalorder %s3945_s8, %s3941_s0 }
  0x25   :  { %p3948_p0 = por %p3947_p13, %p3946_p12 }
  0x27   :  { %p3949_p1 = pnand %p3948_p0, %p3942_p11 }
  0x29   :  { %3952 = shalt.err (!%p3949_p1)
}
  0x2a   :  { %97 = dma.hbm_to_vmem [thread:$0]  %s5168_s10, 48, %s4265_s24, [#allocation11]  }
  0x2b   :  { %s4161_s20 = smov [#allocation13]   ;;  %s5180_s26 = sld [smem:[#allocation29_spill]] }
  0x2c   :  { %s113_s21 = sshll.u32 %s4161_s20, 4  ;;  %s3953_s30 = scalar_lea.hbm %s5170_s12, 2048  ;;  %s114_s21 = int_to_ptr.vmem [resolvable:$true] %s113_s21 }
  0x2d   :  { %p3954_p2 = scmp.ne.s32.totalorder %s5170_s12, %s3953_s30  ;;  %p3957_p3 = scmp.lt.u32.totalorder %s3953_s30, %s5170_s12 }
  0x2f   :  { %p3959_p4 = pnand %p3957_p3, %p3954_p2 }
  0x31   :  { %s36_s27 = sshll.u32 %s5180_s26, 4  ;;  %s37_s27 = int_to_ptr.vmem [resolvable:$true] %s36_s27 }
  0x32   :  { %3962 = shalt.err (!%p3959_p4)
}
  0x33   :  { %s3963_s10 = scalar_lea.vmem %s114_s21, 2048  ;;  %p3968_p6 = scmp.lt.s32.totalorder %s114_s21, %s114_s21 }
  0x34   :  { %p3964_p5 = scmp.ne.s32.totalorder %s114_s21, %s3963_s10  ;;  %p3969_p7 = scmp.lt.s32.totalorder %s3963_s10, %s3963_s10 }
  0x36   :  { %p3970_p8 = por %p3969_p7, %p3968_p6 }
  0x38   :  { %p3971_p9 = pnand %p3970_p8, %p3964_p5 }
  0x3a   :  { %3974 = shalt.err (!%p3971_p9)
}
  0x3b   :  { %s4162_s24 = smov 64   ;;  %s4163_s22 = smov 4  }
  0x3c   :  { %119 = dma.hbm_to_vmem [thread:$0]  %s5170_s12, 2048, %s114_s21, [#allocation14], %s4162_s24, %s4162_s24, %s4163_s22  }
  0x3d   :  { %s3975_s18 = scalar_lea.vmem %s37_s27, 16  ;;  %p3980_p11 = scmp.lt.s32.totalorder %s37_s27, %s37_s27 }
  0x3e   :  { %p3976_p10 = scmp.ne.s32.totalorder %s37_s27, %s3975_s18  ;;  %p3981_p12 = scmp.lt.s32.totalorder %s3975_s18, %s3975_s18 }
  0x40   :  { %p3982_p13 = por %p3981_p12, %p3980_p11 }
  0x42   :  { %p3983_p0 = pnand %p3982_p13, %p3976_p10 }
  0x44   :  { %3986 = shalt.err (!%p3983_p0)
}
  0x45   :  { %s4164_s19 = smov [#allocation2]   ;;  %s4165_s23 = smov [#allocation6]  }
  0x46   :  { %39 = dma.vmem_to_smem %s37_s27, 16, %s4164_s19, [#allocation5]  }
  0x47   :  { %s53_s25 = sshll.u32 %s4165_s23, 4  ;;  %s4166_s26 = smov [#allocation9]   ;;  %s54_s25 = int_to_ptr.vmem [resolvable:$true] %s53_s25 }
  0x48   :  { %s81_s28 = sshll.u32 %s4166_s26, 4  ;;  %s3987_s12 = scalar_lea.hbm %s5163_s5, 3072  ;;  %s4318_s28 = int_to_ptr.vmem [resolvable:$true] %s81_s28 }
  0x49   :  { %p3988_p1 = scmp.ne.s32.totalorder %s5163_s5, %s3987_s12  ;;  %p3991_p2 = scmp.lt.u32.totalorder %s3987_s12, %s5163_s5 }
  0x4b   :  { %p3993_p3 = pnand %p3991_p2, %p3988_p1 }
  0x4d   :  { %3996 = shalt.err (!%p3993_p3)
}
  0x4e   :  { %s3997_s27 = scalar_lea.vmem %s54_s25, 3072  ;;  %p4002_p5 = scmp.lt.s32.totalorder %s54_s25, %s54_s25 }
  0x4f   :  { %p3998_p4 = scmp.ne.s32.totalorder %s54_s25, %s3997_s27  ;;  %p4003_p6 = scmp.lt.s32.totalorder %s3997_s27, %s3997_s27 }
  0x51   :  { %p4004_p7 = por %p4003_p6, %p4002_p5 }
  0x53   :  { %p4005_p8 = pnand %p4004_p7, %p3998_p4 }
  0x55   :  { %4008 = shalt.err (!%p4005_p8)
}
  0x56   :  { %s5181_s17 = smov 12   ;;  %s5182_s20 = smov 192  }
  0x57   :  { %59 = dma.hbm_to_vmem [thread:$0]  %s5163_s5, 3072, %s54_s25, [#allocation3], %s5182_s20, %s5182_s20, %s5181_s17  }
  0x58   :  { %s4009_s29 = scalar_lea.hbm %s5167_s9, 3072 }
  0x59   :  { %p4010_p9 = scmp.ne.s32.totalorder %s5167_s9, %s4009_s29  ;;  %p4013_p10 = scmp.lt.u32.totalorder %s4009_s29, %s5167_s9 }
  0x5b   :  { %p4015_p11 = pnand %p4013_p10, %p4010_p9 }
  0x5d   :  { %4018 = shalt.err (!%p4015_p11)
}
  0x5e   :  { %s4019_s8 = scalar_lea.vmem %s4318_s28, 3072  ;;  %p4024_p13 = scmp.lt.s32.totalorder %s4318_s28, %s4318_s28 }
  0x5f   :  { %p4020_p12 = scmp.ne.s32.totalorder %s4318_s28, %s4019_s8  ;;  %p4025_p0 = scmp.lt.s32.totalorder %s4019_s8, %s4019_s8 }
  0x61   :  { %p4026_p1 = por %p4025_p0, %p4024_p13 }
  0x63   :  { %p4027_p2 = pnand %p4026_p1, %p4020_p12 }
  0x65   :  { %4030 = shalt.err (!%p4027_p2)
}
  0x66   :  { %87 = dma.hbm_to_vmem [thread:$0]  %s5167_s9, 3072, %s4318_s28, [#allocation8], %s5182_s20, %s5182_s20, %s5181_s17  }
  0x67   :  { %s4167_s10 = smov [#allocation12]   ;;  %s4168_s18 = smov [#allocation15]  }
  0x68   :  { %s104_s27 = sshll.u32 %s4167_s10, 4  ;;  %s125_s19 = sshll.u32 %s4168_s18, 4  ;;  %s105_s27 = int_to_ptr.vmem [resolvable:$true] %s104_s27  ;;  %s4355_s19 = int_to_ptr.vmem [resolvable:$true] %s125_s19 }
  0x69   :  { %s4031_s29 = scalar_lea.hbm %s5169_s11, 48 }
  0x6a   :  { %p4032_p3 = scmp.ne.s32.totalorder %s5169_s11, %s4031_s29  ;;  %p4035_p4 = scmp.lt.u32.totalorder %s4031_s29, %s5169_s11 }
  0x6c   :  { %p4037_p5 = pnand %p4035_p4, %p4032_p3 }
  0x6e   :  { %4040 = shalt.err (!%p4037_p5)
}
  0x6f   :  { %s4041_s9 = scalar_lea.vmem %s105_s27, 48  ;;  %s4045_s28 = scalar_lea.vmem %s105_s27, 64 }
  0x70   :  { %p4042_p6 = scmp.ne.s32.totalorder %s105_s27, %s4041_s9  ;;  %p4046_p7 = scmp.lt.s32.totalorder %s105_s27, %s105_s27 }
  0x71   :  { %p4047_p8 = scmp.lt.s32.totalorder %s4045_s28, %s4041_s9 }
  0x73   :  { %p4048_p9 = por %p4047_p8, %p4046_p7 }
  0x75   :  { %p4049_p10 = pnand %p4048_p9, %p4042_p6 }
  0x77   :  { %4052 = shalt.err (!%p4049_p10)
}
  0x78   :  { %107 = dma.hbm_to_vmem [thread:$0]  %s5169_s11, 48, %s105_s27, [#allocation11]  }
  0x79   :  { %s4053_s25 = scalar_lea.hbm %s5171_s13, 1024 }
  0x7a   :  { %p4054_p11 = scmp.ne.s32.totalorder %s5171_s13, %s4053_s25  ;;  %p4057_p12 = scmp.lt.u32.totalorder %s4053_s25, %s5171_s13 }
  0x7c   :  { %p4059_p13 = pnand %p4057_p12, %p4054_p11 }
  0x7e   :  { %4062 = shalt.err (!%p4059_p13)
}
  0x7f   :  { %s4063_s29 = scalar_lea.vmem %s4355_s19, 1024  ;;  %p4068_p1 = scmp.lt.s32.totalorder %s4355_s19, %s4355_s19 }
  0x80   :  { %p4064_p0 = scmp.ne.s32.totalorder %s4355_s19, %s4063_s29  ;;  %p4069_p2 = scmp.lt.s32.totalorder %s4063_s29, %s4063_s29 }
  0x82   :  { %p4070_p3 = por %p4069_p2, %p4068_p1 }
  0x84   :  { %p4071_p4 = pnand %p4070_p3, %p4064_p0 }
  0x86   :  { %4074 = shalt.err (!%p4071_p4)
}
  0x87   :  { %131 = dma.hbm_to_vmem [thread:$0]  %s5171_s13, 1024, %s4355_s19, [#allocation14], %s4162_s24, %s4162_s24, %s4163_s22  }
  0x88   :  { %s4169_s30 = smov [#allocation16]   ;;  %s4075_s9 = scalar_lea.hbm %s5172_s14, 16 }
  0x89   :  { %s138_s12 = sshll.u32 %s4169_s30, 4  ;;  %p4076_p5 = scmp.ne.s32.totalorder %s5172_s14, %s4075_s9  ;;  %s139_s12 = int_to_ptr.vmem [resolvable:$true] %s138_s12 }
  0x8a   :  { %p4079_p6 = scmp.lt.u32.totalorder %s4075_s9, %s5172_s14 }
  0x8c   :  { %p4081_p7 = pnand %p4079_p6, %p4076_p5 }
  0x8e   :  { %4084 = shalt.err (!%p4081_p7)
}
  0x8f   :  { %s4085_s5 = scalar_lea.vmem %s139_s12, 16  ;;  %s4089_s13 = scalar_lea.vmem %s139_s12, 32 }
  0x90   :  { %p4086_p8 = scmp.ne.s32.totalorder %s139_s12, %s4085_s5  ;;  %p4090_p9 = scmp.lt.s32.totalorder %s139_s12, %s139_s12 }
  0x91   :  { %p4091_p10 = scmp.lt.s32.totalorder %s4089_s13, %s4085_s5 }
  0x93   :  { %p4092_p11 = por %p4091_p10, %p4090_p9 }
  0x95   :  { %p4093_p12 = pnand %p4092_p11, %p4086_p8 }
  0x97   :  { %4096 = shalt.err (!%p4093_p12)
}
  0x98   :  { %141 = dma.hbm_to_vmem [thread:$0]  %s5172_s14, 16, %s139_s12, [#allocation17]  }
  0x99   :  { %4129 = dma.done.wait [#allocation5], 16  }
  0x9a   :  { %4130 = vsyncadd [#allocation5], 4294967280 }
  0x9b   :  { %4131 = dma.done.wait [#allocation3], 3072  }
  0x9c   :  { %4132 = vsyncadd [#allocation3], 4294964224 }
  0x9d   :  { %4133 = dma.done.wait [#allocation8], 6144  }
  0x9e   :  { %4134 = vsyncadd [#allocation8], 4294961152 }
  0x9f   :  { %4135 = dma.done.wait [#allocation11], 96  }
  0xa0   :  { %4136 = vsyncadd [#allocation11], 4294967200 }
  0xa1   :  { %4137 = dma.done.wait [#allocation14], 3072  }
  0xa2   :  { %4138 = vsyncadd [#allocation14], 4294964224 }
  0xa3   :  { %4139 = dma.done.wait [#allocation17], 16  }
  0xa4   :  { %4140 = vsyncadd [#allocation17], 4294967280 }
  0xa5   :  { %169 = sfence }
  0xa6   :  { %v3624_v0 = vld [vmem:[%s5162_s4 + $0x4] ss:$12 sps:$4 sm:$0xff]   ;;  %v3626_v1 = vld [vmem:[%s5162_s4] ss:$12 sps:$4 sm:$0xff]   ;;  %v4170_v2 = vmov 0.0   ;;  %v4171_v3 = vmov 0   ;;  %v206_v51 = vlaneseq }
  0xa7   :  { %3187 = vmatprep.subr.bf16.mxu1 %v4170_v2  ;;  %381 = vmatprep.mubr.bf16.mxu0 %v4171_v3  ;;  %v3627_v4 = vld [vmem:[%s5162_s4 + $0x1c] ss:$12 sps:$4 sm:$0xff]   ;;  %vm4172_vm0 = vmmov 0   ;;  %v3629_v5 = vld [vmem:[%s5162_s4 + $0x18] ss:$12 sps:$4 sm:$0xff]   ;;  %vm1537_vm3 = vcmask 1040384  }
  0xa8   :  { %349 = vmatprep.subr.bf16.mxu0 %v3624_v0  ;;  %3203 = vmatprep.mubr.msk.bf16.mxu1 %vm4172_vm0, %v4170_v2  ;;  %v3630_v6 = vld [vmem:[%s5162_s4 + $0x34] ss:$12 sps:$4 sm:$0xff]   ;;  %v3632_v7 = vld [vmem:[%s5162_s4 + $0x30] ss:$12 sps:$4 sm:$0xff]   ;;  %v3633_v8 = vld [vmem:[%s5162_s4 + $0x4c] ss:$12 sps:$4 sm:$0xff]  }
  0xa9   :  { %350 = vmatpush1.bf16.msra.mxu0 %v3626_v1  ;;  %v3645_v9 = vld [vmem:[%s5162_s4 + $0x8] ss:$12 sps:$4 sm:$0xff]   ;;  %v3636_v11 = vld [vmem:[%s5162_s4 + $0x64] ss:$12 sps:$4 sm:$0xff]   ;;  %v3649_v12 = vld [vmem:[%s5162_s4 + $0x20] ss:$12 sps:$4 sm:$0xff]  }
  0xaa   :  { %351 = vmatprep.subr.bf16.mxu0 %v3627_v4  ;;  %v3635_v10 = vld [vmem:[%s5162_s4 + $0x48] ss:$12 sps:$4 sm:$0xff]   ;;  %3188 = vmatpush3.bf16.msra.mxu1 %v3645_v9  ;;  %v3638_v13 = vld [vmem:[%s5162_s4 + $0x60] ss:$12 sps:$4 sm:$0xff]   ;;  %v3653_v15 = vld [vmem:[%s5162_s4 + $0x38] ss:$12 sps:$4 sm:$0xff]  }
  0xab   :  { %3189 = vmatprep.subr.bf16.mxu1 %v4170_v2  ;;  %v3639_v14 = vld [vmem:[%s5162_s4 + $0x7c] ss:$12 sps:$4 sm:$0xff]   ;;  %v3641_v16 = vld [vmem:[%s5162_s4 + $0x78] ss:$12 sps:$4 sm:$0xff]   ;;  %v3642_v17 = vld [vmem:[%s5162_s4 + $0x94] ss:$12 sps:$4 sm:$0xff]  }
  0xac   :  { %v3657_v18 = vld [vmem:[%s5162_s4 + $0x50] ss:$12 sps:$4 sm:$0xff]   ;;  %v3646_v20 = vld [vmem:[%s5162_s4 + $0xac] ss:$12 sps:$4 sm:$0xff]   ;;  %v3661_v21 = vld [vmem:[%s5162_s4 + $0x68] ss:$12 sps:$4 sm:$0xff]  }
  0xad   :  { %352 = vmatpush1.bf16.msra.mxu0 %v3629_v5  ;;  %v3644_v19 = vld [vmem:[%s5162_s4 + $0x90] ss:$12 sps:$4 sm:$0xff]   ;;  %v3648_v22 = vld [vmem:[%s5162_s4 + $0xa8] ss:$12 sps:$4 sm:$0xff]   ;;  %v3665_v24 = vld [vmem:[%s5162_s4 + $0x80] ss:$12 sps:$4 sm:$0xff]  }
  0xae   :  { %353 = vmatprep.subr.bf16.mxu0 %v3630_v6  ;;  %3190 = vmatpush3.bf16.msra.mxu1 %v3649_v12  ;;  %v4472_v23 = vld [vmem:[#allocation6 + $0x4] ss:$12 sps:$4 sm:$0xff]   ;;  %v171_v25 = vld [vmem:[%s5159_s1] sm:$0xf]  ;;  %v4483_v27 = vld [vmem:[#allocation6 + $0x1c] ss:$12 sps:$4 sm:$0xff]  }
  0xaf   :  { %3191 = vmatprep.subr.bf16.mxu1 %v4170_v2  ;;  %v4481_v26 = vld [vmem:[#allocation6] ss:$12 sps:$4 sm:$0xff]   ;;  %v3669_v28 = vld [vmem:[%s5162_s4 + $0x98] ss:$12 sps:$4 sm:$0xff]   ;;  %v3673_v31 = vld [vmem:[%s5162_s4 + $0xb0] ss:$12 sps:$4 sm:$0xff]  }
  0xb0   :  { %v4490_v29 = vld [vmem:[#allocation6 + $0x18] ss:$12 sps:$4 sm:$0xff]   ;;  %v4493_v30 = vld [vmem:[#allocation6 + $0x34] ss:$12 sps:$4 sm:$0xff]   ;;  %v4502_v32 = vld [vmem:[#allocation6 + $0x30] ss:$12 sps:$4 sm:$0xff]  }
  0xb1   :  { %354 = vmatpush1.bf16.msra.mxu0 %v3632_v7  ;;  %v4505_v33 = vld [vmem:[#allocation6 + $0x4c] ss:$12 sps:$4 sm:$0xff]   ;;  %v4507_v34 = vld [vmem:[#allocation6 + $0x8] ss:$12 sps:$4 sm:$0xff]   ;;  %v4514_v36 = vld [vmem:[#allocation6 + $0x64] ss:$12 sps:$4 sm:$0xff]  }
  0xb2   :  { %355 = vmatprep.subr.bf16.mxu0 %v3633_v8  ;;  %3192 = vmatpush3.bf16.msra.mxu1 %v3653_v15  ;;  %v4511_v35 = vld [vmem:[#allocation6 + $0x48] ss:$12 sps:$4 sm:$0xff]   ;;  %v4517_v37 = vld [vmem:[#allocation6 + $0x20] ss:$12 sps:$4 sm:$0xff]   ;;  %v4529_v40 = vld [vmem:[#allocation6 + $0x38] ss:$12 sps:$4 sm:$0xff]  }
  0xb3   :  { %3193 = vmatprep.subr.bf16.mxu1 %v4170_v2  ;;  %v4523_v38 = vld [vmem:[#allocation6 + $0x60] ss:$12 sps:$4 sm:$0xff]   ;;  %v4526_v39 = vld [vmem:[#allocation6 + $0x7c] ss:$12 sps:$4 sm:$0xff]   ;;  %v4533_v41 = vld [vmem:[#allocation6 + $0x78] ss:$12 sps:$4 sm:$0xff]  }
  0xb4   :  { %v4536_v42 = vld [vmem:[#allocation6 + $0x94] ss:$12 sps:$4 sm:$0xff]   ;;  %v4539_v43 = vld [vmem:[#allocation6 + $0x50] ss:$12 sps:$4 sm:$0xff]   ;;  %v4546_v45 = vld [vmem:[#allocation6 + $0xac] ss:$12 sps:$4 sm:$0xff]  }
  0xb5   :  { %356 = vmatpush1.bf16.msra.mxu0 %v3635_v10  ;;  %v4543_v44 = vld [vmem:[#allocation6 + $0x90] ss:$12 sps:$4 sm:$0xff]   ;;  %v4549_v46 = vld [vmem:[#allocation6 + $0x68] ss:$12 sps:$4 sm:$0xff]   ;;  %v4557_v48 = vld [vmem:[#allocation6 + $0x80] ss:$12 sps:$4 sm:$0xff]  }
  0xb6   :  { %357 = vmatprep.subr.bf16.mxu0 %v3636_v11  ;;  %3194 = vmatpush3.bf16.msra.mxu1 %v3657_v18  ;;  %v4553_v47 = vld [vmem:[#allocation6 + $0xa8] ss:$12 sps:$4 sm:$0xff]   ;;  %v4562_v49 = vld [vmem:[#allocation6 + $0x98] ss:$12 sps:$4 sm:$0xff]   ;;  %v4570_v50 = vld [vmem:[#allocation6 + $0xb0] ss:$12 sps:$4 sm:$0xff]  }
  0xb7   :  { %3195 = vmatprep.subr.bf16.mxu1 %v4170_v2  ;;  %v4609_v52 = vand.u32 127, %v206_v51  ;;  %v207_v63 = vshrl.u32 %v206_v51, 7  ;;  %v204_v1 = vld [vmem:[%s5164_s6] sm:$0x7]  ;;  %vm1539_vm4 = vcmask 1041408   ;;  %vm1541_vm5 = vcmask 1042432  }
  0xb8   :  { %v462_v4 = vld [vmem:[%s5165_s7] sm:$0x7]  ;;  %vm1543_vm6 = vcmask 1043456   ;;  %vm1545_vm7 = vcmask 1044480   ;;  %vm1547_vm8 = vcmask 1045504   ;;  %vm1549_vm9 = vcmask 1046528  }
  0xb9   :  { %358 = vmatpush1.bf16.msra.mxu0 %v3638_v13  ;;  %v1561_v53 = vcvt.s32.f32 %v4609_v52  ;;  %vm1562_vm1 = vcmp.eq.s32.totalorder %v4609_v52, 0  ;;  %vm1563_vm2 = vcmp.eq.s32.totalorder %v4609_v52, 127  ;;  %v4617_v0 = vsub.s32 0, %v207_v63  ;;  %s4941_s26 = smov 0  }
  0xba   :  { %359 = vmatprep.subr.bf16.mxu0 %v3639_v14  ;;  %3196 = vmatpush3.bf16.msra.mxu1 %v3661_v21  ;;  %v4615_v54 = vsel %vm1563_vm2, 1.0, %v4170_v2  ;;  %v4625_v5 = vsub.s32 1, %v207_v63 }
  0xbb   :  { %3197 = vmatprep.subr.bf16.mxu1 %v4170_v2  ;;  %v209_v6 = vrot.slane %v204_v1, %v4617_v0  ;;  %v4629_v7 = vrot.slane %v462_v4, %v4617_v0 }
  0xbc   :  { %v4632_v8 = vrot.slane %v462_v4, %v4625_v5  ;;  %v213_v9 = vrot.slane %v204_v1, %v4625_v5 }
  0xbd   :  { %360 = vmatpush1.bf16.msra.mxu0 %v3641_v16 }
  0xbe   :  { %361 = vmatprep.subr.bf16.mxu0 %v3642_v17  ;;  %3198 = vmatpush3.bf16.msra.mxu1 %v3665_v24 }
  0xbf   :  { %3199 = vmatprep.subr.bf16.mxu1 %v4170_v2 }
  0xc1   :  { %362 = vmatpush1.bf16.msra.mxu0 %v3644_v19 }
  0xc2   :  { %363 = vmatprep.subr.bf16.mxu0 %v3646_v20  ;;  %3200 = vmatpush3.bf16.msra.mxu1 %v3669_v28 }
  0xc3   :  { %3201 = vmatprep.subr.bf16.mxu1 %v4170_v2 }
  0xc5   :  { %364 = vmatpush1.bf16.msra.mxu0 %v3648_v22 }
  0xc6   :  { %607 = vmatprep.subr.bf16.mxu0 %v4472_v23  ;;  %3202 = vmatpush3.bf16.msra.mxu1 %v3673_v31 }
  0xc7   :  { %3207 = vmatprep.subr.bf16.mxu1 %v4170_v2 }
  0xc8   :  { %382 = vmatmul.mubr.bf16.vlgmr.msra.gmra.mrb[0].mxu0 %v171_v25 }
  0xc9   :  { %608 = vmatpush1.bf16.msra.mxu0 %v4481_v26  ;;  %639 = vmatprep.mubr.bf16.mxu0 %v4171_v3 }
  0xca   :  { %609 = vmatprep.subr.bf16.mxu0 %v4483_v27  ;;  %3204 = vmatmul.mubr.bf16.vlgmr.msra.gmra.mrb[0].mxu1 %v171_v25 }
  0xcb   :  { %3208 = vmatpush3.bf16.msra.mxu1 %v4507_v34  ;;  %3223 = vmatprep.mubr.msk.bf16.mxu1 %vm4172_vm0, %v4170_v2 }
  0xcc   :  { %3209 = vmatprep.subr.bf16.mxu1 %v4170_v2 }
  0xcd   :  { %610 = vmatpush1.bf16.msra.mxu0 %v4490_v29 }
  0xce   :  { %611 = vmatprep.subr.bf16.mxu0 %v4493_v30 }
  0xcf   :  { %3210 = vmatpush3.bf16.msra.mxu1 %v4517_v37 }
  0xd0   :  { %3211 = vmatprep.subr.bf16.mxu1 %v4170_v2 }
  0xd1   :  { %612 = vmatpush1.bf16.msra.mxu0 %v4502_v32 }
  0xd2   :  { %613 = vmatprep.subr.bf16.mxu0 %v4505_v33 }
  0xd3   :  { %3212 = vmatpush3.bf16.msra.mxu1 %v4529_v40 }
  0xd4   :  { %3213 = vmatprep.subr.bf16.mxu1 %v4170_v2 }
  0xd5   :  { %614 = vmatpush1.bf16.msra.mxu0 %v4511_v35 }
  0xd6   :  { %615 = vmatprep.subr.bf16.mxu0 %v4514_v36 }
  0xd7   :  { %3214 = vmatpush3.bf16.msra.mxu1 %v4539_v43 }
  0xd8   :  { %3215 = vmatprep.subr.bf16.mxu1 %v4170_v2 }
  0xd9   :  { %616 = vmatpush1.bf16.msra.mxu0 %v4523_v38 }
  0xda   :  { %617 = vmatprep.subr.bf16.mxu0 %v4526_v39 }
  0xdb   :  { %3216 = vmatpush3.bf16.msra.mxu1 %v4549_v46 }
  0xdc   :  { %3217 = vmatprep.subr.bf16.mxu1 %v4170_v2 }
  0xdd   :  { %618 = vmatpush1.bf16.msra.mxu0 %v4533_v41 }
  0xde   :  { %619 = vmatprep.subr.bf16.mxu0 %v4536_v42 }
  0xdf   :  { %3218 = vmatpush3.bf16.msra.mxu1 %v4557_v48 }
  0xe0   :  { %3219 = vmatprep.subr.bf16.mxu1 %v4170_v2 }
  0xe1   :  { %620 = vmatpush1.bf16.msra.mxu0 %v4543_v44 }
  0xe2   :  { %621 = vmatprep.subr.bf16.mxu0 %v4546_v45 }
  0xe3   :  { %3220 = vmatpush3.bf16.msra.mxu1 %v4562_v49 }
  0xe4   :  { %3221 = vmatprep.subr.bf16.mxu1 %v4170_v2 }
  0xe5   :  { %622 = vmatpush1.bf16.msra.mxu0 %v4553_v47 }
  0xe6   :  { %710 = vmatprep.subr.bf16.mxu0 %v4472_v23 }
  0xe7   :  { %3222 = vmatpush3.bf16.msra.mxu1 %v4570_v50 }
  0xe8   :  { %640 = vmatmul.mubr.bf16.vlgmr.msra.gmra.mrb[4].mxu0 %v4171_v3  ;;  %3227 = vmatprep.subr.bf16.mxu1 %v4170_v2 }
  0xe9   :  { %711 = vmatpush1.bf16.msra.mxu0 %v4481_v26  ;;  %742 = vmatprep.mubr.bf16.mxu0 %v4171_v3 }
  0xea   :  { %712 = vmatprep.subr.bf16.mxu0 %v4483_v27  ;;  %3224 = vmatmul.mubr.bf16.vlgmr.msra.gmra.mrb[4].mxu1 %v4171_v3 }
  0xeb   :  { %3228 = vmatpush3.bf16.msra.mxu1 %v4507_v34  ;;  %3243 = vmatprep.mubr.msk.bf16.mxu1 %vm4172_vm0, %v4170_v2 }
  0xec   :  { %3229 = vmatprep.subr.bf16.mxu1 %v4170_v2 }
  0xed   :  { %713 = vmatpush1.bf16.msra.mxu0 %v4490_v29 }
  0xee   :  { %714 = vmatprep.subr.bf16.mxu0 %v4493_v30 }
  0xef   :  { %3230 = vmatpush3.bf16.msra.mxu1 %v4517_v37 }
  0xf0   :  { %3231 = vmatprep.subr.bf16.mxu1 %v4170_v2 }
  0xf1   :  { %715 = vmatpush1.bf16.msra.mxu0 %v4502_v32 }
  0xf2   :  { %716 = vmatprep.subr.bf16.mxu0 %v4505_v33 }
  0xf3   :  { %3232 = vmatpush3.bf16.msra.mxu1 %v4529_v40 }
  0xf4   :  { %3233 = vmatprep.subr.bf16.mxu1 %v4170_v2 }
  0xf5   :  { %717 = vmatpush1.bf16.msra.mxu0 %v4511_v35 }
  0xf6   :  { %718 = vmatprep.subr.bf16.mxu0 %v4514_v36 }
  0xf7   :  { %3234 = vmatpush3.bf16.msra.mxu1 %v4539_v43 }
  0xf8   :  { %3235 = vmatprep.subr.bf16.mxu1 %v4170_v2 }
  0xf9   :  { %719 = vmatpush1.bf16.msra.mxu0 %v4523_v38 }
  0xfa   :  { %720 = vmatprep.subr.bf16.mxu0 %v4526_v39 }
  0xfb   :  { %3236 = vmatpush3.bf16.msra.mxu1 %v4549_v46 }
  0xfc   :  { %3237 = vmatprep.subr.bf16.mxu1 %v4170_v2 }
  0xfd   :  { %721 = vmatpush1.bf16.msra.mxu0 %v4533_v41 }
  0xfe   :  { %722 = vmatprep.subr.bf16.mxu0 %v4536_v42 }
  0xff   :  { %3238 = vmatpush3.bf16.msra.mxu1 %v4557_v48 }
 0x100   :  { %3239 = vmatprep.subr.bf16.mxu1 %v4170_v2 }
 0x101   :  { %723 = vmatpush1.bf16.msra.mxu0 %v4543_v44 }
 0x102   :  { %724 = vmatprep.subr.bf16.mxu0 %v4546_v45 }
 0x103   :  { %3240 = vmatpush3.bf16.msra.mxu1 %v4562_v49 }
 0x104   :  { %3241 = vmatprep.subr.bf16.mxu1 %v4170_v2 }
 0x105   :  { %725 = vmatpush1.bf16.msra.mxu0 %v4553_v47 }
 0x106   :  { %829 = vmatprep.subr.bf16.mxu0 %v4472_v23 }
 0x107   :  { %3242 = vmatpush3.bf16.msra.mxu1 %v4570_v50 }
 0x108   :  { %3247 = vmatprep.subr.bf16.mxu1 %v4170_v2 }
 0x19b   :  { %v383_v55 = vpop.f32.mrb[0].mxu0 }
 0x19c   :  { %v385_v56 = vpop.f32.mrb[1].mxu0  ;;  %v4635_v11 = vadd.f32 %v383_v55, %v209_v6  ;;  %v4643_v55 = vsub.s32 2, %v207_v63 }
 0x19d   :  { %v387_v57 = vpop.f32.mrb[2].mxu0  ;;  %v424_v59 = vpop.f32.mrb[0].mxu1  ;;  %v4640_v18 = vadd.f32 %v385_v56, %v213_v9 }
 0x19e   :  { %v388_v58 = vpop.f32.mrb[3].mxu0  ;;  %v3205_v60 = vpop.f32.mrb[1].mxu1  ;;  %v4646_v57 = vrot.slane %v462_v4, %v4643_v55 }
 0x19f   :  { %v427_v61 = vpop.f32.mrb[2].mxu1  ;;  %v217_v58 = vrot.slane %v204_v1, %v4643_v55 }
 0x1a0   :  { %v3206_v62 = vpop.f32.mrb[3].mxu1 }
 0x1a1   :  { %v4650_v6 = vadd.f32 %v424_v59, %v217_v58 }
 0x1bb   :  { %v641_v10 = vpop.f32.mrb[4].mxu0 }
 0x1bc   :  { %v642_v12 = vadd.f32 %v641_v10, %v4629_v7  ;;  %v643_v13 = vpop.f32.mrb[5].mxu0 }
 0x1bd   :  { %v644_v14 = vadd.f32 %v643_v13, %v4632_v8  ;;  %v645_v15 = vpop.f32.mrb[6].mxu0  ;;  %v682_v21 = vpop.f32.mrb[4].mxu1 }
 0x1be   :  { %v688_v16 = vadd.f32 %v642_v12, %v4635_v11  ;;  %v646_v17 = vpop.f32.mrb[7].mxu0  ;;  %v3225_v24 = vpop.f32.mrb[5].mxu1  ;;  %v683_v61 = vadd.f32 %v682_v21, %v4646_v57 }
 0x1bf   :  { %v695_v20 = vadd.f32 %v644_v14, %v4640_v18  ;;  %v685_v25 = vpop.f32.mrb[6].mxu1 }
 0x1c0   :  { %v2929_v19 = vmul.f32 -1.442695, %v688_v16  ;;  %v3226_v28 = vpop.f32.mrb[7].mxu1 }
 0x1c1   :  { %v2930_v22 = vmul.f32 -1.442695, %v695_v20 }
 0x1c2   :  { %3689 = vpow2.f32 %v2929_v19 }
 0x1c3   :  { %3691 = vpow2.f32 %v2930_v22 }
 0x1cc   :  { %v3690_v31 = vpop.eup %3689 }
 0x1cd   :  { %v692_v51 = vadd.f32 1.0, %v3690_v31  ;;  %v3692_v56 = vpop.eup %3691 }
 0x1ce   :  { %v699_v60 = vadd.f32 1.0, %v3692_v56 }
 0x1cf   :  { %3693 = vrcp.f32 %v692_v51 }
 0x1d0   :  { %3695 = vrcp.f32 %v699_v60 }
 0x1d9   :  { %v3694_v62 = vpop.eup %3693 }
 0x1da   :  { %v702_v9 = vmul.f32 %v3694_v62, %v683_v61  ;;  %v3696_v12 = vpop.eup %3695 }
 0x1db   :  { %v705_v63 = vsub.f32 1.0, %v3696_v12  ;;  %v707_v4 = vmul.f32 0.0, %v3696_v12 }
 0x1dc   :  { %v703_v10 = vadd.f32 %v702_v9, %v4650_v6 }
 0x1de   :  { %3697 = vtanh.f32 %v703_v10 }
 0x1e8   :  { %v3698_v13 = vpop.eup %3697 }
 0x1e9   :  { %v706_v14 = vmul.f32 %v3698_v13, %v705_v63 }
 0x1eb   :  { %v4653_v15 = vadd.f32 %v707_v4, %v706_v14 }
 0x1ed   :  { %v709_v1 = vpack.c.bf16 %v4653_v15, %v4653_v15 }
 0x1ef   :  { %743 = vmatmul.mubr.bf16.vlgmr.msra.gmra.mrb[8].mxu0 %v709_v1  ;;  %3244 = vmatmul.mubr.bf16.vlgmr.msra.gmra.mrb[8].mxu1 %v709_v1 }
 0x1f0   :  { %830 = vmatpush1.bf16.msra.mxu0 %v4481_v26  ;;  %3248 = vmatpush3.bf16.msra.mxu1 %v4507_v34 }
 0x1f1   :  { %831 = vmatprep.subr.bf16.mxu0 %v4483_v27  ;;  %3249 = vmatprep.subr.bf16.mxu1 %v4170_v2 }
 0x1f2   :  { %861 = vmatprep.mubr.bf16.mxu0 %v4171_v3  ;;  %3263 = vmatprep.mubr.msk.bf16.mxu1 %vm4172_vm0, %v4170_v2 }
 0x1f4   :  { %832 = vmatpush1.bf16.msra.mxu0 %v4490_v29  ;;  %3250 = vmatpush3.bf16.msra.mxu1 %v4517_v37 }
 0x1f5   :  { %833 = vmatprep.subr.bf16.mxu0 %v4493_v30  ;;  %3251 = vmatprep.subr.bf16.mxu1 %v4170_v2 }
 0x1f8   :  { %834 = vmatpush1.bf16.msra.mxu0 %v4502_v32  ;;  %3252 = vmatpush3.bf16.msra.mxu1 %v4529_v40 }
 0x1f9   :  { %835 = vmatprep.subr.bf16.mxu0 %v4505_v33  ;;  %3253 = vmatprep.subr.bf16.mxu1 %v4170_v2 }
 0x1fc   :  { %836 = vmatpush1.bf16.msra.mxu0 %v4511_v35  ;;  %3254 = vmatpush3.bf16.msra.mxu1 %v4539_v43 }
 0x1fd   :  { %837 = vmatprep.subr.bf16.mxu0 %v4514_v36  ;;  %3255 = vmatprep.subr.bf16.mxu1 %v4170_v2 }
 0x200   :  { %838 = vmatpush1.bf16.msra.mxu0 %v4523_v38  ;;  %3256 = vmatpush3.bf16.msra.mxu1 %v4549_v46 }
 0x201   :  { %839 = vmatprep.subr.bf16.mxu0 %v4526_v39  ;;  %3257 = vmatprep.subr.bf16.mxu1 %v4170_v2 }
 0x204   :  { %840 = vmatpush1.bf16.msra.mxu0 %v4533_v41  ;;  %3258 = vmatpush3.bf16.msra.mxu1 %v4557_v48 }
 0x205   :  { %841 = vmatprep.subr.bf16.mxu0 %v4536_v42  ;;  %3259 = vmatprep.subr.bf16.mxu1 %v4170_v2 }
 0x208   :  { %842 = vmatpush1.bf16.msra.mxu0 %v4543_v44  ;;  %3260 = vmatpush3.bf16.msra.mxu1 %v4562_v49 }
 0x209   :  { %843 = vmatprep.subr.bf16.mxu0 %v4546_v45  ;;  %3261 = vmatprep.subr.bf16.mxu1 %v4170_v2 }
 0x20c   :  { %844 = vmatpush1.bf16.msra.mxu0 %v4553_v47  ;;  %3262 = vmatpush3.bf16.msra.mxu1 %v4570_v50 }
 0x20d   :  { %947 = vmatprep.subr.bf16.mxu0 %v4472_v23  ;;  %3267 = vmatprep.subr.bf16.mxu1 %v4170_v2 }
 0x2c2   :  { %v744_v59 = vpop.f32.mrb[8].mxu0  ;;  %v785_v16 = vpop.f32.mrb[8].mxu1 }
 0x2c3   :  { %v745_v17 = vadd.f32 %v744_v59, %v4629_v7  ;;  %v746_v19 = vpop.f32.mrb[9].mxu0  ;;  %v3245_v20 = vpop.f32.mrb[9].mxu1  ;;  %v786_v12 = vadd.f32 %v785_v16, %v4646_v57 }
 0x2c4   :  { %v747_v21 = vadd.f32 %v746_v19, %v4632_v8  ;;  %v748_v22 = vpop.f32.mrb[10].mxu0  ;;  %v788_v24 = vpop.f32.mrb[10].mxu1  ;;  %v820_v19 = vrot.slane %v4653_v15, 7 }
 0x2c5   :  { %v792_v25 = vrot.slane %v745_v17, 7  ;;  %v749_v28 = vpop.f32.mrb[11].mxu0  ;;  %v3246_v31 = vpop.f32.mrb[11].mxu1  ;;  %v812_v13 = vrot.slane %v786_v12, 7 }
 0x2c6   :  { %v802_v51 = vrot.slane %v747_v21, 7 }
 0x2c7   :  { %v794_v56 = vadd.f32 %v792_v25, %v4635_v11 }
 0x2c8   :  { %v804_v60 = vadd.f32 %v802_v51, %v4640_v18 }
 0x2c9   :  { %v2931_v58 = vmul.f32 -1.442695, %v794_v56 }
 0x2ca   :  { %v2932_v61 = vmul.f32 -1.442695, %v804_v60 }
 0x2cb   :  { %3699 = vpow2.f32 %v2931_v58 }
 0x2cc   :  { %3701 = vpow2.f32 %v2932_v61 }
 0x2d5   :  { %v3700_v62 = vpop.eup %3699 }
 0x2d6   :  { %v798_v9 = vadd.f32 1.0, %v3700_v62  ;;  %v3702_v10 = vpop.eup %3701 }
 0x2d7   :  { %v808_v63 = vadd.f32 1.0, %v3702_v10 }
 0x2d8   :  { %3703 = vrcp.f32 %v798_v9 }
 0x2d9   :  { %3705 = vrcp.f32 %v808_v63 }
 0x2e2   :  { %v3704_v14 = vpop.eup %3703 }
 0x2e3   :  { %v814_v4 = vmul.f32 %v3704_v14, %v812_v13  ;;  %v3706_v59 = vpop.eup %3705 }
 0x2e4   :  { %v817_v17 = vsub.f32 1.0, %v3706_v59  ;;  %v822_v22 = vmul.f32 %v3706_v59, %v820_v19 }
 0x2e5   :  { %v815_v1 = vadd.f32 %v814_v4, %v4650_v6 }
 0x2e7   :  { %3707 = vtanh.f32 %v815_v1 }
 0x2f1   :  { %v3708_v20 = vpop.eup %3707 }
 0x2f2   :  { %v818_v21 = vmul.f32 %v3708_v20, %v817_v17 }
 0x2f4   :  { %v4699_v24 = vadd.f32 %v822_v22, %v818_v21 }
 0x2f6   :  { %v824_v16 = vpack.c.bf16 %v4699_v24, %v4699_v24 }
 0x2f8   :  { %v826_v25 = vshrl.u32 %v824_v16, 16 }
 0x2fa   :  { %862 = vmatmul.mubr.bf16.vlgmr.msra.gmra.mrb[12].mxu0 %v826_v25  ;;  %3264 = vmatmul.mubr.bf16.vlgmr.msra.gmra.mrb[12].mxu1 %v826_v25  ;;  %v939_v25 = vrot.slane %v4699_v24, 7 }
 0x2fb   :  { %948 = vmatpush1.bf16.msra.mxu0 %v4481_v26  ;;  %3268 = vmatpush3.bf16.msra.mxu1 %v4507_v34 }
 0x2fc   :  { %949 = vmatprep.subr.bf16.mxu0 %v4483_v27  ;;  %3269 = vmatprep.subr.bf16.mxu1 %v4170_v2 }
 0x2fd   :  { %979 = vmatprep.mubr.bf16.mxu0 %v4171_v3  ;;  %3283 = vmatprep.mubr.msk.bf16.mxu1 %vm4172_vm0, %v4170_v2 }
 0x2ff   :  { %950 = vmatpush1.bf16.msra.mxu0 %v4490_v29  ;;  %3270 = vmatpush3.bf16.msra.mxu1 %v4517_v37 }
 0x300   :  { %951 = vmatprep.subr.bf16.mxu0 %v4493_v30  ;;  %3271 = vmatprep.subr.bf16.mxu1 %v4170_v2 }
 0x303   :  { %952 = vmatpush1.bf16.msra.mxu0 %v4502_v32  ;;  %3272 = vmatpush3.bf16.msra.mxu1 %v4529_v40 }
 0x304   :  { %953 = vmatprep.subr.bf16.mxu0 %v4505_v33  ;;  %3273 = vmatprep.subr.bf16.mxu1 %v4170_v2 }
 0x307   :  { %954 = vmatpush1.bf16.msra.mxu0 %v4511_v35  ;;  %3274 = vmatpush3.bf16.msra.mxu1 %v4539_v43 }
 0x308   :  { %955 = vmatprep.subr.bf16.mxu0 %v4514_v36  ;;  %3275 = vmatprep.subr.bf16.mxu1 %v4170_v2 }
 0x30b   :  { %956 = vmatpush1.bf16.msra.mxu0 %v4523_v38  ;;  %3276 = vmatpush3.bf16.msra.mxu1 %v4549_v46 }
 0x30c   :  { %957 = vmatprep.subr.bf16.mxu0 %v4526_v39  ;;  %3277 = vmatprep.subr.bf16.mxu1 %v4170_v2 }
 0x30f   :  { %958 = vmatpush1.bf16.msra.mxu0 %v4533_v41  ;;  %3278 = vmatpush3.bf16.msra.mxu1 %v4557_v48 }
 0x310   :  { %959 = vmatprep.subr.bf16.mxu0 %v4536_v42  ;;  %3279 = vmatprep.subr.bf16.mxu1 %v4170_v2 }
 0x313   :  { %960 = vmatpush1.bf16.msra.mxu0 %v4543_v44  ;;  %3280 = vmatpush3.bf16.msra.mxu1 %v4562_v49 }
 0x314   :  { %961 = vmatprep.subr.bf16.mxu0 %v4546_v45  ;;  %3281 = vmatprep.subr.bf16.mxu1 %v4170_v2 }
 0x317   :  { %962 = vmatpush1.bf16.msra.mxu0 %v4553_v47  ;;  %3282 = vmatpush3.bf16.msra.mxu1 %v4570_v50 }
 0x318   :  { %1067 = vmatprep.subr.bf16.mxu0 %v4472_v23  ;;  %3287 = vmatprep.subr.bf16.mxu1 %v4170_v2 }
 0x3cd   :  { %v863_v28 = vpop.f32.mrb[12].mxu0  ;;  %v904_v31 = vpop.f32.mrb[12].mxu1 }
 0x3ce   :  { %v864_v51 = vadd.f32 %v863_v28, %v4629_v7  ;;  %v865_v56 = vpop.f32.mrb[13].mxu0  ;;  %v3265_v58 = vpop.f32.mrb[13].mxu1  ;;  %v905_v21 = vadd.f32 %v904_v31, %v4646_v57  ;;  %v1538_v31 = vsel %vm1537_vm3, %v4653_v15, %v4699_v24 }
 0x3cf   :  { %v866_v60 = vadd.f32 %v865_v56, %v4632_v8  ;;  %v867_v61 = vpop.f32.mrb[14].mxu0  ;;  %v907_v62 = vpop.f32.mrb[14].mxu1 }
 0x3d0   :  { %v911_v9 = vrot.slane %v864_v51, 6  ;;  %v868_v10 = vpop.f32.mrb[15].mxu0  ;;  %v3266_v12 = vpop.f32.mrb[15].mxu1  ;;  %v931_v22 = vrot.slane %v905_v21, 6 }
 0x3d1   :  { %v921_v63 = vrot.slane %v866_v60, 6 }
 0x3d2   :  { %v913_v13 = vadd.f32 %v911_v9, %v4635_v11 }
 0x3d3   :  { %v923_v14 = vadd.f32 %v921_v63, %v4640_v18 }
 0x3d4   :  { %v2933_v4 = vmul.f32 -1.442695, %v913_v13 }
 0x3d5   :  { %v2934_v1 = vmul.f32 -1.442695, %v923_v14 }
 0x3d6   :  { %3709 = vpow2.f32 %v2933_v4 }
 0x3d7   :  { %3711 = vpow2.f32 %v2934_v1 }
 0x3e0   :  { %v3710_v59 = vpop.eup %3709 }
 0x3e1   :  { %v3712_v17 = vpop.eup %3711  ;;  %v917_v19 = vadd.f32 1.0, %v3710_v59 }
 0x3e2   :  { %v927_v20 = vadd.f32 1.0, %v3712_v17 }
 0x3e3   :  { %3713 = vrcp.f32 %v917_v19 }
 0x3e4   :  { %3715 = vrcp.f32 %v927_v20 }
 0x3ed   :  { %v3714_v16 = vpop.eup %3713 }
 0x3ee   :  { %v3716_v28 = vpop.eup %3715  ;;  %v933_v51 = vmul.f32 %v3714_v16, %v931_v22 }
 0x3ef   :  { %v941_v56 = vmul.f32 %v3716_v28, %v939_v25  ;;  %v936_v60 = vsub.f32 1.0, %v3716_v28 }
 0x3f0   :  { %v934_v58 = vadd.f32 %v933_v51, %v4650_v6 }
 0x3f2   :  { %3717 = vtanh.f32 %v934_v58 }
 0x3fc   :  { %v3718_v61 = vpop.eup %3717 }
 0x3fd   :  { %v937_v62 = vmul.f32 %v3718_v61, %v936_v60 }
 0x3ff   :  { %v4745_v9 = vadd.f32 %v941_v56, %v937_v62 }
 0x401   :  { %v943_v10 = vpack.c.bf16 %v4745_v9, %v4745_v9  ;;  %v4753_v12 = vsel %vm1539_vm4, %v1538_v31, %v4745_v9 }
 0x403   :  { %v945_v63 = vrot.slane %v943_v10, 1 }
 0x405   :  { %980 = vmatmul.mubr.bf16.vlgmr.msra.gmra.mrb[16].mxu0 %v945_v63  ;;  %3284 = vmatmul.mubr.bf16.vlgmr.msra.gmra.mrb[16].mxu1 %v945_v63  ;;  %v1057_v63 = vrot.slane %v4745_v9, 7 }
 0x406   :  { %1068 = vmatpush1.bf16.msra.mxu0 %v4481_v26  ;;  %3288 = vmatpush3.bf16.msra.mxu1 %v4507_v34 }
 0x407   :  { %1069 = vmatprep.subr.bf16.mxu0 %v4483_v27  ;;  %3289 = vmatprep.subr.bf16.mxu1 %v4170_v2 }
 0x408   :  { %1099 = vmatprep.mubr.bf16.mxu0 %v4171_v3  ;;  %3303 = vmatprep.mubr.msk.bf16.mxu1 %vm4172_vm0, %v4170_v2 }
 0x40a   :  { %1070 = vmatpush1.bf16.msra.mxu0 %v4490_v29  ;;  %3290 = vmatpush3.bf16.msra.mxu1 %v4517_v37 }
 0x40b   :  { %1071 = vmatprep.subr.bf16.mxu0 %v4493_v30  ;;  %3291 = vmatprep.subr.bf16.mxu1 %v4170_v2 }
 0x40e   :  { %1072 = vmatpush1.bf16.msra.mxu0 %v4502_v32  ;;  %3292 = vmatpush3.bf16.msra.mxu1 %v4529_v40 }
 0x40f   :  { %1073 = vmatprep.subr.bf16.mxu0 %v4505_v33  ;;  %3293 = vmatprep.subr.bf16.mxu1 %v4170_v2 }
 0x412   :  { %1074 = vmatpush1.bf16.msra.mxu0 %v4511_v35  ;;  %3294 = vmatpush3.bf16.msra.mxu1 %v4539_v43 }
 0x413   :  { %1075 = vmatprep.subr.bf16.mxu0 %v4514_v36  ;;  %3295 = vmatprep.subr.bf16.mxu1 %v4170_v2 }
 0x416   :  { %1076 = vmatpush1.bf16.msra.mxu0 %v4523_v38  ;;  %3296 = vmatpush3.bf16.msra.mxu1 %v4549_v46 }
 0x417   :  { %1077 = vmatprep.subr.bf16.mxu0 %v4526_v39  ;;  %3297 = vmatprep.subr.bf16.mxu1 %v4170_v2 }
 0x41a   :  { %1078 = vmatpush1.bf16.msra.mxu0 %v4533_v41  ;;  %3298 = vmatpush3.bf16.msra.mxu1 %v4557_v48 }
 0x41b   :  { %1079 = vmatprep.subr.bf16.mxu0 %v4536_v42  ;;  %3299 = vmatprep.subr.bf16.mxu1 %v4170_v2 }
 0x41e   :  { %1080 = vmatpush1.bf16.msra.mxu0 %v4543_v44  ;;  %3300 = vmatpush3.bf16.msra.mxu1 %v4562_v49 }
 0x41f   :  { %1081 = vmatprep.subr.bf16.mxu0 %v4546_v45  ;;  %3301 = vmatprep.subr.bf16.mxu1 %v4170_v2 }
 0x422   :  { %1082 = vmatpush1.bf16.msra.mxu0 %v4553_v47  ;;  %3302 = vmatpush3.bf16.msra.mxu1 %v4570_v50 }
 0x423   :  { %1185 = vmatprep.subr.bf16.mxu0 %v4472_v23  ;;  %3307 = vmatprep.subr.bf16.mxu1 %v4170_v2 }
 0x4d8   :  { %v981_v15 = vpop.f32.mrb[16].mxu0  ;;  %v1022_v24 = vpop.f32.mrb[16].mxu1 }
 0x4d9   :  { %v982_v13 = vadd.f32 %v981_v15, %v4629_v7  ;;  %v983_v14 = vpop.f32.mrb[17].mxu0  ;;  %v3285_v4 = vpop.f32.mrb[17].mxu1  ;;  %v1023_v62 = vadd.f32 %v1022_v24, %v4646_v57 }
 0x4da   :  { %v984_v1 = vadd.f32 %v983_v14, %v4632_v8  ;;  %v985_v59 = vpop.f32.mrb[18].mxu0  ;;  %v1025_v17 = vpop.f32.mrb[18].mxu1 }
 0x4db   :  { %v1029_v19 = vrot.slane %v982_v13, 5  ;;  %v986_v20 = vpop.f32.mrb[19].mxu0  ;;  %v3286_v21 = vpop.f32.mrb[19].mxu1  ;;  %v1049_v31 = vrot.slane %v1023_v62, 5 }
 0x4dc   :  { %v1039_v22 = vrot.slane %v984_v1, 5 }
 0x4dd   :  { %v1031_v16 = vadd.f32 %v1029_v19, %v4635_v11 }
 0x4de   :  { %v1041_v25 = vadd.f32 %v1039_v22, %v4640_v18 }
 0x4df   :  { %v2935_v28 = vmul.f32 -1.442695, %v1031_v16 }
 0x4e0   :  { %v2936_v51 = vmul.f32 -1.442695, %v1041_v25 }
 0x4e1   :  { %3719 = vpow2.f32 %v2935_v28 }
 0x4e2   :  { %3721 = vpow2.f32 %v2936_v51 }
 0x4eb   :  { %v3720_v56 = vpop.eup %3719 }
 0x4ec   :  { %v3722_v58 = vpop.eup %3721  ;;  %v1035_v60 = vadd.f32 1.0, %v3720_v56 }
 0x4ed   :  { %v1045_v61 = vadd.f32 1.0, %v3722_v58 }
 0x4ee   :  { %3723 = vrcp.f32 %v1035_v60 }
 0x4ef   :  { %3725 = vrcp.f32 %v1045_v61 }
 0x4f8   :  { %v3724_v10 = vpop.eup %3723 }
 0x4f9   :  { %v3726_v15 = vpop.eup %3725  ;;  %v1051_v13 = vmul.f32 %v3724_v10, %v1049_v31 }
 0x4fa   :  { %v1059_v14 = vmul.f32 %v3726_v15, %v1057_v63  ;;  %v1054_v1 = vsub.f32 1.0, %v3726_v15 }
 0x4fb   :  { %v1052_v4 = vadd.f32 %v1051_v13, %v4650_v6 }
 0x4fd   :  { %3727 = vtanh.f32 %v1052_v4 }
 0x507   :  { %v3728_v59 = vpop.eup %3727 }
 0x508   :  { %v1055_v17 = vmul.f32 %v3728_v59, %v1054_v1 }
 0x50a   :  { %v4797_v19 = vadd.f32 %v1059_v14, %v1055_v17 }
 0x50c   :  { %v1061_v20 = vpack.c.bf16 %v4797_v19, %v4797_v19  ;;  %v4803_v24 = vsel %vm1541_vm5, %v4753_v12, %v4797_v19 }
 0x50e   :  { %v1063_v9 = vshrl.u32 %v1061_v20, 16 }
 0x510   :  { %v1065_v21 = vrot.slane %v1063_v9, 1  ;;  %v1177_v9 = vrot.slane %v4797_v19, 7 }
 0x512   :  { %1100 = vmatmul.mubr.bf16.vlgmr.msra.gmra.mrb[20].mxu0 %v1065_v21  ;;  %3304 = vmatmul.mubr.bf16.vlgmr.msra.gmra.mrb[20].mxu1 %v1065_v21 }
 0x513   :  { %1186 = vmatpush1.bf16.msra.mxu0 %v4481_v26  ;;  %3308 = vmatpush3.bf16.msra.mxu1 %v4507_v34 }
 0x514   :  { %1187 = vmatprep.subr.bf16.mxu0 %v4483_v27  ;;  %3309 = vmatprep.subr.bf16.mxu1 %v4170_v2 }
 0x515   :  { %1217 = vmatprep.mubr.bf16.mxu0 %v4171_v3  ;;  %3323 = vmatprep.mubr.msk.bf16.mxu1 %vm4172_vm0, %v4170_v2 }
 0x517   :  { %1188 = vmatpush1.bf16.msra.mxu0 %v4490_v29  ;;  %3310 = vmatpush3.bf16.msra.mxu1 %v4517_v37 }
 0x518   :  { %1189 = vmatprep.subr.bf16.mxu0 %v4493_v30  ;;  %3311 = vmatprep.subr.bf16.mxu1 %v4170_v2 }
 0x51b   :  { %1190 = vmatpush1.bf16.msra.mxu0 %v4502_v32  ;;  %3312 = vmatpush3.bf16.msra.mxu1 %v4529_v40 }
 0x51c   :  { %1191 = vmatprep.subr.bf16.mxu0 %v4505_v33  ;;  %3313 = vmatprep.subr.bf16.mxu1 %v4170_v2 }
 0x51f   :  { %1192 = vmatpush1.bf16.msra.mxu0 %v4511_v35  ;;  %3314 = vmatpush3.bf16.msra.mxu1 %v4539_v43 }
 0x520   :  { %1193 = vmatprep.subr.bf16.mxu0 %v4514_v36  ;;  %3315 = vmatprep.subr.bf16.mxu1 %v4170_v2 }
 0x523   :  { %1194 = vmatpush1.bf16.msra.mxu0 %v4523_v38  ;;  %3316 = vmatpush3.bf16.msra.mxu1 %v4549_v46 }
 0x524   :  { %1195 = vmatprep.subr.bf16.mxu0 %v4526_v39  ;;  %3317 = vmatprep.subr.bf16.mxu1 %v4170_v2 }
 0x527   :  { %1196 = vmatpush1.bf16.msra.mxu0 %v4533_v41  ;;  %3318 = vmatpush3.bf16.msra.mxu1 %v4557_v48 }
 0x528   :  { %1197 = vmatprep.subr.bf16.mxu0 %v4536_v42  ;;  %3319 = vmatprep.subr.bf16.mxu1 %v4170_v2 }
 0x52b   :  { %1198 = vmatpush1.bf16.msra.mxu0 %v4543_v44  ;;  %3320 = vmatpush3.bf16.msra.mxu1 %v4562_v49 }
 0x52c   :  { %1199 = vmatprep.subr.bf16.mxu0 %v4546_v45  ;;  %3321 = vmatprep.subr.bf16.mxu1 %v4170_v2 }
 0x52f   :  { %1200 = vmatpush1.bf16.msra.mxu0 %v4553_v47  ;;  %3322 = vmatpush3.bf16.msra.mxu1 %v4570_v50 }
 0x530   :  { %1305 = vmatprep.subr.bf16.mxu0 %v4472_v23  ;;  %3327 = vmatprep.subr.bf16.mxu1 %v4170_v2 }
 0x5e5   :  { %v1101_v12 = vpop.f32.mrb[20].mxu0  ;;  %v1142_v22 = vpop.f32.mrb[20].mxu1 }
 0x5e6   :  { %v1102_v16 = vadd.f32 %v1101_v12, %v4629_v7  ;;  %v1103_v25 = vpop.f32.mrb[21].mxu0  ;;  %v3305_v28 = vpop.f32.mrb[21].mxu1  ;;  %v1143_v59 = vadd.f32 %v1142_v22, %v4646_v57 }
 0x5e7   :  { %v1104_v51 = vadd.f32 %v1103_v25, %v4632_v8  ;;  %v1105_v56 = vpop.f32.mrb[22].mxu0  ;;  %v1145_v58 = vpop.f32.mrb[22].mxu1 }
 0x5e8   :  { %v1149_v60 = vrot.slane %v1102_v16, 4  ;;  %v1106_v61 = vpop.f32.mrb[23].mxu0  ;;  %v3306_v62 = vpop.f32.mrb[23].mxu1  ;;  %v1169_v17 = vrot.slane %v1143_v59, 4 }
 0x5e9   :  { %v1159_v31 = vrot.slane %v1104_v51, 4 }
 0x5ea   :  { %v1151_v10 = vadd.f32 %v1149_v60, %v4635_v11 }
 0x5eb   :  { %v1161_v23 = vadd.f32 %v1159_v31, %v4640_v18 }
 0x5ec   :  { %v2937_v63 = vmul.f32 -1.442695, %v1151_v10 }
 0x5ed   :  { %v2938_v15 = vmul.f32 -1.442695, %v1161_v23 }
 0x5ee   :  { %3729 = vpow2.f32 %v2937_v63 }
 0x5ef   :  { %3731 = vpow2.f32 %v2938_v15 }
 0x5f8   :  { %v3730_v13 = vpop.eup %3729 }
 0x5f9   :  { %v3732_v14 = vpop.eup %3731  ;;  %v1155_v4 = vadd.f32 1.0, %v3730_v13 }
 0x5fa   :  { %v1165_v1 = vadd.f32 1.0, %v3732_v14 }
 0x5fb   :  { %3733 = vrcp.f32 %v1155_v4 }
 0x5fc   :  { %3735 = vrcp.f32 %v1165_v1 }
 0x605   :  { %v3734_v20 = vpop.eup %3733 }
 0x606   :  { %v3736_v21 = vpop.eup %3735  ;;  %v1171_v12 = vmul.f32 %v3734_v20, %v1169_v17  ;;  %v3770_v20 = vld [vmem:[#allocation6] ss:$12 sps:$4 sm:$0xff]  }
 0x607   :  { %v1179_v16 = vmul.f32 %v3736_v21, %v1177_v9  ;;  %v1174_v28 = vsub.f32 1.0, %v3736_v21  ;;  %v3771_v9 = vld [vmem:[#allocation6 + $0x8] ss:$12 sps:$4 sm:$0xff]  }
 0x608   :  { %v1172_v25 = vadd.f32 %v1171_v12, %v4650_v6  ;;  %v3772_v21 = vld [vmem:[#allocation6 + $0x1c] ss:$12 sps:$4 sm:$0xff]   ;;  %v3773_v12 = vld [vmem:[#allocation6 + $0x18] ss:$12 sps:$4 sm:$0xff]  }
 0x60a   :  { %3737 = vtanh.f32 %v1172_v25  ;;  %v3775_v25 = vld [vmem:[#allocation6 + $0x34] ss:$12 sps:$4 sm:$0xff]  }
 0x614   :  { %v3738_v51 = vpop.eup %3737 }
 0x615   :  { %v1175_v56 = vmul.f32 %v3738_v51, %v1174_v28  ;;  %v3776_v28 = vld [vmem:[#allocation6 + $0x30] ss:$12 sps:$4 sm:$0xff]   ;;  %v3777_v51 = vld [vmem:[#allocation6 + $0x38] ss:$12 sps:$4 sm:$0xff]  }
 0x617   :  { %v4847_v58 = vadd.f32 %v1179_v16, %v1175_v56  ;;  %v3774_v16 = vld [vmem:[#allocation6 + $0x20] ss:$12 sps:$4 sm:$0xff]  }
 0x618   :  { %v3778_v56 = vld [vmem:[#allocation6 + $0x4c] ss:$12 sps:$4 sm:$0xff]  }
 0x619   :  { %v1181_v60 = vpack.c.bf16 %v4847_v58, %v4847_v58  ;;  %v4853_v22 = vsel %vm1543_vm6, %v4803_v24, %v4847_v58  ;;  %v1295_v61 = vrot.slane %v4847_v58, 7  ;;  %v3780_v58 = vld [vmem:[#allocation6 + $0x50] ss:$12 sps:$4 sm:$0xff]  }
 0x61b   :  { %v1183_v19 = vrot.slane %v1181_v60, 2  ;;  %v3781_v60 = vld [vmem:[#allocation6 + $0x64] ss:$12 sps:$4 sm:$0xff]  }
 0x61d   :  { %1218 = vmatmul.mubr.bf16.vlgmr.msra.gmra.mrb[24].mxu0 %v1183_v19  ;;  %3324 = vmatmul.mubr.bf16.vlgmr.msra.gmra.mrb[24].mxu1 %v1183_v19  ;;  %v3783_v19 = vld [vmem:[#allocation6 + $0x68] ss:$12 sps:$4 sm:$0xff]  }
 0x61e   :  { %1306 = vmatpush1.bf16.msra.mxu0 %v4481_v26  ;;  %3328 = vmatpush3.bf16.msra.mxu1 %v4507_v34  ;;  %v3769_v26 = vld [vmem:[#allocation6 + $0x4] ss:$12 sps:$4 sm:$0xff]  }
 0x61f   :  { %1307 = vmatprep.subr.bf16.mxu0 %v4483_v27  ;;  %3329 = vmatprep.subr.bf16.mxu1 %v4170_v2 }
 0x620   :  { %1337 = vmatprep.mubr.bf16.mxu0 %v4171_v3  ;;  %3343 = vmatprep.mubr.msk.bf16.mxu1 %vm4172_vm0, %v4170_v2 }
 0x622   :  { %1308 = vmatpush1.bf16.msra.mxu0 %v4490_v29  ;;  %3330 = vmatpush3.bf16.msra.mxu1 %v4517_v37 }
 0x623   :  { %1309 = vmatprep.subr.bf16.mxu0 %v4493_v30  ;;  %3331 = vmatprep.subr.bf16.mxu1 %v4170_v2 }
 0x626   :  { %1310 = vmatpush1.bf16.msra.mxu0 %v4502_v32  ;;  %3332 = vmatpush3.bf16.msra.mxu1 %v4529_v40 }
 0x627   :  { %1311 = vmatprep.subr.bf16.mxu0 %v4505_v33  ;;  %3333 = vmatprep.subr.bf16.mxu1 %v4170_v2 }
 0x62a   :  { %1312 = vmatpush1.bf16.msra.mxu0 %v4511_v35  ;;  %3334 = vmatpush3.bf16.msra.mxu1 %v4539_v43 }
 0x62b   :  { %1313 = vmatprep.subr.bf16.mxu0 %v4514_v36  ;;  %3335 = vmatprep.subr.bf16.mxu1 %v4170_v2 }
 0x62e   :  { %1314 = vmatpush1.bf16.msra.mxu0 %v4523_v38  ;;  %3336 = vmatpush3.bf16.msra.mxu1 %v4549_v46 }
 0x62f   :  { %1315 = vmatprep.subr.bf16.mxu0 %v4526_v39  ;;  %3337 = vmatprep.subr.bf16.mxu1 %v4170_v2 }
 0x632   :  { %1316 = vmatpush1.bf16.msra.mxu0 %v4533_v41  ;;  %3338 = vmatpush3.bf16.msra.mxu1 %v4557_v48 }
 0x633   :  { %1317 = vmatprep.subr.bf16.mxu0 %v4536_v42  ;;  %3339 = vmatprep.subr.bf16.mxu1 %v4170_v2 }
 0x636   :  { %1318 = vmatpush1.bf16.msra.mxu0 %v4543_v44  ;;  %3340 = vmatpush3.bf16.msra.mxu1 %v4562_v49 }
 0x637   :  { %1319 = vmatprep.subr.bf16.mxu0 %v4546_v45  ;;  %3341 = vmatprep.subr.bf16.mxu1 %v4170_v2 }
 0x63a   :  { %1320 = vmatpush1.bf16.msra.mxu0 %v4553_v47  ;;  %3342 = vmatpush3.bf16.msra.mxu1 %v4570_v50 }
 0x63b   :  { %1423 = vmatprep.subr.bf16.mxu0 %v3769_v26  ;;  %3347 = vmatprep.subr.bf16.mxu1 %v4170_v2  ;;  %v3784_v26 = vld [vmem:[#allocation6 + $0x7c] ss:$12 sps:$4 sm:$0xff]  }
 0x6f0   :  { %v1219_v27 = vpop.f32.mrb[24].mxu0  ;;  %v1260_v29 = vpop.f32.mrb[24].mxu1 }
 0x6f1   :  { %v1220_v30 = vadd.f32 %v1219_v27, %v4629_v7  ;;  %v1221_v32 = vpop.f32.mrb[25].mxu0  ;;  %v3325_v33 = vpop.f32.mrb[25].mxu1  ;;  %v1261_v49 = vadd.f32 %v1260_v29, %v4646_v57  ;;  %v3785_v27 = vld [vmem:[#allocation6 + $0x78] ss:$12 sps:$4 sm:$0xff]   ;;  %v3786_v29 = vld [vmem:[#allocation6 + $0x80] ss:$12 sps:$4 sm:$0xff]  }
 0x6f2   :  { %v1222_v34 = vadd.f32 %v1221_v32, %v4632_v8  ;;  %v1223_v35 = vpop.f32.mrb[26].mxu0  ;;  %v1263_v36 = vpop.f32.mrb[26].mxu1  ;;  %v3788_v32 = vld [vmem:[#allocation6 + $0x90] ss:$12 sps:$4 sm:$0xff]   ;;  %v3789_v33 = vld [vmem:[#allocation6 + $0x98] ss:$12 sps:$4 sm:$0xff]  }
 0x6f3   :  { %v1267_v37 = vrot.slane %v1220_v30, 3  ;;  %v1224_v38 = vpop.f32.mrb[27].mxu0  ;;  %v3326_v39 = vpop.f32.mrb[27].mxu1  ;;  %v1287_v50 = vrot.slane %v1261_v49, 3  ;;  %v3787_v30 = vld [vmem:[#allocation6 + $0x94] ss:$12 sps:$4 sm:$0xff]  }
 0x6f4   :  { %v1277_v40 = vrot.slane %v1222_v34, 3  ;;  %v3790_v34 = vld [vmem:[#allocation6 + $0xac] ss:$12 sps:$4 sm:$0xff]   ;;  %v3791_v35 = vld [vmem:[#allocation6 + $0xa8] ss:$12 sps:$4 sm:$0xff]  }
 0x6f5   :  { %v1269_v41 = vadd.f32 %v1267_v37, %v4635_v11  ;;  %v3792_v36 = vld [vmem:[#allocation6 + $0xb0] ss:$12 sps:$4 sm:$0xff]  }
 0x6f6   :  { %v1279_v42 = vadd.f32 %v1277_v40, %v4640_v18 }
 0x6f7   :  { %v2939_v43 = vmul.f32 -1.442695, %v1269_v41 }
 0x6f8   :  { %v2940_v44 = vmul.f32 -1.442695, %v1279_v42 }
 0x6f9   :  { %3739 = vpow2.f32 %v2939_v43 }
 0x6fa   :  { %3741 = vpow2.f32 %v2940_v44 }
 0x703   :  { %v3740_v45 = vpop.eup %3739 }
 0x704   :  { %v3742_v46 = vpop.eup %3741  ;;  %v1273_v47 = vadd.f32 1.0, %v3740_v45 }
 0x705   :  { %v1283_v48 = vadd.f32 1.0, %v3742_v46 }
 0x706   :  { %3743 = vrcp.f32 %v1273_v47 }
 0x707   :  { %3745 = vrcp.f32 %v1283_v48 }
 0x710   :  { %v3744_v24 = vpop.eup %3743 }
 0x711   :  { %v3746_v62 = vpop.eup %3745  ;;  %v1289_v31 = vmul.f32 %v3744_v24, %v1287_v50 }
 0x712   :  { %v1297_v10 = vmul.f32 %v3746_v62, %v1295_v61  ;;  %v1292_v63 = vsub.f32 1.0, %v3746_v62 }
 0x713   :  { %v1290_v23 = vadd.f32 %v1289_v31, %v4650_v6 }
 0x715   :  { %3747 = vtanh.f32 %v1290_v23 }
 0x71f   :  { %v3748_v15 = vpop.eup %3747 }
 0x720   :  { %v1293_v13 = vmul.f32 %v3748_v15, %v1292_v63 }
 0x722   :  { %v4896_v14 = vadd.f32 %v1297_v10, %v1293_v13 }
 0x724   :  { %v1299_v4 = vpack.c.bf16 %v4896_v14, %v4896_v14  ;;  %v4902_v1 = vsel %vm1545_vm7, %v4853_v22, %v4896_v14  ;;  %v3782_v22 = vld [vmem:[#allocation6 + $0x60] ss:$12 sps:$4 sm:$0xff]   ;;  %v1415_v13 = vrot.slane %v4896_v14, 7 }
 0x725   :  { %v3688_v14 = vld [vmem:[%s5160_s2] ss:$0 sps:$4 sm:$0x11]  }
 0x726   :  { %v1301_v59 = vshrl.u32 %v1299_v4, 16 }
 0x728   :  { %v1303_v17 = vrot.slane %v1301_v59, 2 }
 0x72a   :  { %1338 = vmatmul.mubr.bf16.vlgmr.msra.gmra.mrb[28].mxu0 %v1303_v17  ;;  %3344 = vmatmul.mubr.bf16.vlgmr.msra.gmra.mrb[28].mxu1 %v1303_v17 }
 0x72b   :  { %1424 = vmatpush1.bf16.msra.mxu0 %v3770_v20  ;;  %3348 = vmatpush3.bf16.msra.mxu1 %v3771_v9 }
 0x72c   :  { %1425 = vmatprep.subr.bf16.mxu0 %v3772_v21  ;;  %3349 = vmatprep.subr.bf16.mxu1 %v4170_v2 }
 0x72d   :  { %1455 = vmatprep.mubr.bf16.mxu0 %v4171_v3  ;;  %3363 = vmatprep.mubr.msk.bf16.mxu1 %vm4172_vm0, %v4170_v2  ;;  %v3779_v3 = vld [vmem:[#allocation6 + $0x48] ss:$12 sps:$4 sm:$0xff]  }
 0x72f   :  { %1426 = vmatpush1.bf16.msra.mxu0 %v3773_v12  ;;  %3350 = vmatpush3.bf16.msra.mxu1 %v3774_v16 }
 0x730   :  { %1427 = vmatprep.subr.bf16.mxu0 %v3775_v25  ;;  %3351 = vmatprep.subr.bf16.mxu1 %v4170_v2 }
 0x733   :  { %1428 = vmatpush1.bf16.msra.mxu0 %v3776_v28  ;;  %3352 = vmatpush3.bf16.msra.mxu1 %v3777_v51 }
 0x734   :  { %1429 = vmatprep.subr.bf16.mxu0 %v3778_v56  ;;  %3353 = vmatprep.subr.bf16.mxu1 %v4170_v2  ;;  %v1571_v56 = vshrl.u32 %v3688_v14, 16  }
 0x737   :  { %1430 = vmatpush1.bf16.msra.mxu0 %v3779_v3  ;;  %3354 = vmatpush3.bf16.msra.mxu1 %v3780_v58 }
 0x738   :  { %1431 = vmatprep.subr.bf16.mxu0 %v3781_v60  ;;  %3355 = vmatprep.subr.bf16.mxu1 %v4170_v2 }
 0x73b   :  { %1432 = vmatpush1.bf16.msra.mxu0 %v3782_v22  ;;  %3356 = vmatpush3.bf16.msra.mxu1 %v3783_v19 }
 0x73c   :  { %1433 = vmatprep.subr.bf16.mxu0 %v3784_v26  ;;  %3357 = vmatprep.subr.bf16.mxu1 %v4170_v2 }
 0x73f   :  { %1434 = vmatpush1.bf16.msra.mxu0 %v3785_v27  ;;  %3358 = vmatpush3.bf16.msra.mxu1 %v3786_v29 }
 0x740   :  { %1435 = vmatprep.subr.bf16.mxu0 %v3787_v30  ;;  %3359 = vmatprep.subr.bf16.mxu1 %v4170_v2 }
 0x743   :  { %1436 = vmatpush1.bf16.msra.mxu0 %v3788_v32  ;;  %3360 = vmatpush3.bf16.msra.mxu1 %v3789_v33 }
 0x744   :  { %1437 = vmatprep.subr.bf16.mxu0 %v3790_v34  ;;  %3361 = vmatprep.subr.bf16.mxu1 %v4170_v2 }
 0x747   :  { %1438 = vmatpush1.bf16.msra.mxu0 %v3791_v35  ;;  %3362 = vmatpush3.bf16.msra.mxu1 %v3792_v36 }
 0x7fd   :  { %v1339_v37 = vpop.f32.mrb[28].mxu0  ;;  %v1380_v38 = vpop.f32.mrb[28].mxu1 }
 0x7fe   :  { %v1340_v39 = vadd.f32 %v1339_v37, %v4629_v7  ;;  %v1341_v40 = vpop.f32.mrb[29].mxu0  ;;  %v3345_v41 = vpop.f32.mrb[29].mxu1  ;;  %v1381_v23 = vadd.f32 %v1380_v38, %v4646_v57 }
 0x7ff   :  { %v1342_v42 = vadd.f32 %v1341_v40, %v4632_v8  ;;  %v1343_v43 = vpop.f32.mrb[30].mxu0  ;;  %v1383_v44 = vpop.f32.mrb[30].mxu1 }
 0x800   :  { %v1387_v45 = vrot.slane %v1340_v39, 2  ;;  %v1344_v46 = vpop.f32.mrb[31].mxu0  ;;  %v3346_v47 = vpop.f32.mrb[31].mxu1  ;;  %v1407_v63 = vrot.slane %v1381_v23, 2 }
 0x801   :  { %v1397_v48 = vrot.slane %v1342_v42, 2 }
 0x802   :  { %v1389_v2 = vadd.f32 %v1387_v45, %v4635_v11 }
 0x803   :  { %v1399_v49 = vadd.f32 %v1397_v48, %v4640_v18 }
 0x804   :  { %v2941_v50 = vmul.f32 -1.442695, %v1389_v2 }
 0x805   :  { %v2942_v24 = vmul.f32 -1.442695, %v1399_v49 }
 0x806   :  { %3749 = vpow2.f32 %v2941_v50 }
 0x807   :  { %3751 = vpow2.f32 %v2942_v24 }
 0x810   :  { %v3750_v61 = vpop.eup %3749 }
 0x811   :  { %v3752_v62 = vpop.eup %3751  ;;  %v1393_v31 = vadd.f32 1.0, %v3750_v61 }
 0x812   :  { %v1403_v10 = vadd.f32 1.0, %v3752_v62 }
 0x813   :  { %3753 = vrcp.f32 %v1393_v31 }
 0x814   :  { %3755 = vrcp.f32 %v1403_v10 }
 0x81d   :  { %v3754_v15 = vpop.eup %3753 }
 0x81e   :  { %v3756_v4 = vpop.eup %3755  ;;  %v1409_v59 = vmul.f32 %v3754_v15, %v1407_v63 }
 0x81f   :  { %v1417_v17 = vmul.f32 %v3756_v4, %v1415_v13  ;;  %v1412_v9 = vsub.f32 1.0, %v3756_v4 }
 0x820   :  { %v1410_v20 = vadd.f32 %v1409_v59, %v4650_v6 }
 0x822   :  { %3757 = vtanh.f32 %v1410_v20 }
 0x82c   :  { %v3758_v21 = vpop.eup %3757 }
 0x82d   :  { %v1413_v12 = vmul.f32 %v3758_v21, %v1412_v9 }
 0x82f   :  { %v1418_v16 = vadd.f32 %v1417_v17, %v1413_v12 }
 0x831   :  { %v1419_v25 = vpack.c.bf16 %v1418_v16, %v1418_v16  ;;  %v1548_v28 = vsel %vm1547_vm8, %v4902_v1, %v1418_v16  ;;  %v1533_v43 = vrot.slane %v1418_v16, 7 }
 0x833   :  { %v1421_v51 = vrot.slane %v1419_v25, 3 }
 0x835   :  { %1456 = vmatmul.mubr.bf16.vlgmr.msra.gmra.mrb[32].mxu0 %v1421_v51  ;;  %3364 = vmatmul.mubr.bf16.vlgmr.msra.gmra.mrb[32].mxu1 %v1421_v51 }
 0x908   :  { %v1457_v3 = vpop.f32.mrb[32].mxu0  ;;  %v1498_v58 = vpop.f32.mrb[32].mxu1 }
 0x909   :  { %v1458_v60 = vadd.f32 %v1457_v3, %v4629_v7  ;;  %v1459_v22 = vpop.f32.mrb[33].mxu0  ;;  %v3365_v19 = vpop.f32.mrb[33].mxu1 }
 0x90a   :  { %v1460_v26 = vadd.f32 %v1459_v22, %v4632_v8  ;;  %v1461_v27 = vpop.f32.mrb[34].mxu0  ;;  %v1501_v29 = vpop.f32.mrb[34].mxu1  ;;  %v1499_v8 = vadd.f32 %v1498_v58, %v4646_v57 }
 0x90b   :  { %v1505_v30 = vrot.slane %v1458_v60, 1  ;;  %v1462_v1 = vpop.f32.mrb[35].mxu0  ;;  %v3366_v32 = vpop.f32.mrb[35].mxu1 }
 0x90c   :  { %v1515_v33 = vrot.slane %v1460_v26, 1  ;;  %v1525_v41 = vrot.slane %v1499_v8, 1 }
 0x90d   :  { %v1507_v34 = vadd.f32 %v1505_v30, %v4635_v11 }
 0x90e   :  { %v1517_v35 = vadd.f32 %v1515_v33, %v4640_v18 }
 0x90f   :  { %v2943_v36 = vmul.f32 -1.442695, %v1507_v34 }
 0x910   :  { %v2944_v37 = vmul.f32 -1.442695, %v1517_v35 }
 0x911   :  { %3759 = vpow2.f32 %v2943_v36 }
 0x912   :  { %3761 = vpow2.f32 %v2944_v37 }
 0x91b   :  { %v3760_v38 = vpop.eup %3759 }
 0x91c   :  { %v3762_v7 = vpop.eup %3761  ;;  %v1511_v39 = vadd.f32 1.0, %v3760_v38 }
 0x91d   :  { %v1521_v40 = vadd.f32 1.0, %v3762_v7 }
 0x91e   :  { %3763 = vrcp.f32 %v1511_v39 }
 0x91f   :  { %3765 = vrcp.f32 %v1521_v40 }
 0x928   :  { %v3764_v42 = vpop.eup %3763 }
 0x929   :  { %v3766_v44 = vpop.eup %3765  ;;  %v1527_v45 = vmul.f32 %v3764_v42, %v1525_v41 }
 0x92a   :  { %v1535_v11 = vmul.f32 %v3766_v44, %v1533_v43  ;;  %v1530_v46 = vsub.f32 1.0, %v3766_v44 }
 0x92b   :  { %v1528_v18 = vadd.f32 %v1527_v45, %v4650_v6 }
 0x92d   :  { %3767 = vtanh.f32 %v1528_v18 }
 0x937   :  { %v3768_v47 = vpop.eup %3767 }
 0x938   :  { %v1531_v48 = vmul.f32 %v3768_v47, %v1530_v46 }
 0x93a   :  { %v1536_v2 = vadd.f32 %v1535_v11, %v1531_v48 }
 0x93c   :  { %v4931_v49 = vsel %vm1549_vm9, %v1548_v28, %v1536_v2  ;;  %v1575_v50 = vrot.slane %v1536_v2, 7  }
 0x93d   :  { %v1551_v24 = vrot.slane %v4931_v49, 4 }
 0x93f   :  { %v1552_v57 = vadd.f32 %v1551_v24, %v4931_v49 }
 0x941   :  { %v1553_v61 = vrot.slane %v1552_v57, 2 }
 0x943   :  { %v1554_v62 = vadd.f32 %v1553_v61, %v1552_v57 }
 0x945   :  { %v1555_v31 = vrot.slane %v1554_v62, 1 }
 0x947   :  { %v1556_v10 = vadd.f32 %v1555_v31, %v1554_v62 }
 0x949   :  { %v4935_v23 = vmul.f32 0.125, %v1556_v10 }
 0x94a LB: > { %v3793_v6 = vld [vmem:[#allocation7 + $0x4] ss:$12 sps:$4 sm:$0xff]   ;;  %v3795_v63 = vld [vmem:[#allocation7] ss:$12 sps:$4 sm:$0xff]   ;;  %v4173_v15 = vmov 0.0   ;;  %v4174_v13 = vmov 0   ;;  %v1843_v2 = vpack.c.bf16 %v4147_v50, %v4147_v50  ;;  %s4155_s26 = sphi %s4941_s26, %s1582_s26   ;;  %v4151_v56 = vphi %v1571_v56, %v2809_v56   ;;  %v4147_v50 = vphi %v1575_v50, %v4993_v50  }
 0x94b   : > { %3367 = vmatprep.subr.bf16.mxu1 %v4173_v15  ;;  %1794 = vmatprep.mubr.bf16.mxu0 %v4174_v13  ;;  %v3796_v4 = vld [vmem:[#allocation7 + $0x1c] ss:$12 sps:$4 sm:$0xff]   ;;  %vm4175_vm10 = vmmov 0   ;;  %v3798_v59 = vld [vmem:[#allocation7 + $0x18] ss:$12 sps:$4 sm:$0xff]   ;;  %vm2193_vm11 = vcmask 57344  }
 0x94c   : > { %1762 = vmatprep.subr.bf16.mxu0 %v3793_v6  ;;  %3383 = vmatprep.mubr.msk.bf16.mxu1 %vm4175_vm10, %v4173_v15  ;;  %v3799_v17 = vld [vmem:[#allocation7 + $0x34] ss:$12 sps:$4 sm:$0xff]   ;;  %v3801_v20 = vld [vmem:[#allocation7 + $0x30] ss:$12 sps:$4 sm:$0xff]   ;;  %v3802_v9 = vld [vmem:[#allocation7 + $0x4c] ss:$12 sps:$4 sm:$0xff]  }
 0x94d   : > { %1763 = vmatpush1.bf16.msra.mxu0 %v3795_v63  ;;  %v3813_v21 = vld [vmem:[#allocation7 + $0x8] ss:$12 sps:$4 sm:$0xff]   ;;  %v3805_v16 = vld [vmem:[#allocation7 + $0x64] ss:$12 sps:$4 sm:$0xff]   ;;  %v3817_v25 = vld [vmem:[#allocation7 + $0x20] ss:$12 sps:$4 sm:$0xff]  }
 0x94e   : > { %1764 = vmatprep.subr.bf16.mxu0 %v3796_v4  ;;  %v3804_v12 = vld [vmem:[#allocation7 + $0x48] ss:$12 sps:$4 sm:$0xff]   ;;  %3368 = vmatpush3.bf16.msra.mxu1 %v3813_v21  ;;  %v3807_v28 = vld [vmem:[#allocation7 + $0x60] ss:$12 sps:$4 sm:$0xff]   ;;  %v3819_v51 = vld [vmem:[#allocation7 + $0x38] ss:$12 sps:$4 sm:$0xff]  }
 0x94f   : > { %3369 = vmatprep.subr.bf16.mxu1 %v4173_v15  ;;  %v3808_v14 = vld [vmem:[#allocation7 + $0x7c] ss:$12 sps:$4 sm:$0xff]   ;;  %v3810_v3 = vld [vmem:[#allocation7 + $0x78] ss:$12 sps:$4 sm:$0xff]   ;;  %v3811_v60 = vld [vmem:[#allocation7 + $0x94] ss:$12 sps:$4 sm:$0xff]  }
 0x950   : > { %v3823_v58 = vld [vmem:[#allocation7 + $0x50] ss:$12 sps:$4 sm:$0xff]   ;;  %v3827_v19 = vld [vmem:[#allocation7 + $0x68] ss:$12 sps:$4 sm:$0xff]   ;;  %v3815_v26 = vld [vmem:[#allocation7 + $0xac] ss:$12 sps:$4 sm:$0xff]  }
 0x951   : > { %1765 = vmatpush1.bf16.msra.mxu0 %v3798_v59  ;;  %v3814_v22 = vld [vmem:[#allocation7 + $0x90] ss:$12 sps:$4 sm:$0xff]   ;;  %v3818_v27 = vld [vmem:[#allocation7 + $0xa8] ss:$12 sps:$4 sm:$0xff]   ;;  %v3831_v29 = vld [vmem:[#allocation7 + $0x80] ss:$12 sps:$4 sm:$0xff]  }
 0x952   : > { %1766 = vmatprep.subr.bf16.mxu0 %v3799_v17  ;;  %3370 = vmatpush3.bf16.msra.mxu1 %v3817_v25  ;;  %v3822_v30 = vld [vmem:[#allocation9 + $0x4] ss:$12 sps:$4 sm:$0xff]   ;;  %v3820_v1 = vld [vmem:[#allocation9] ss:$12 sps:$4 sm:$0xff]   ;;  %v3826_v33 = vld [vmem:[#allocation9 + $0x1c] ss:$12 sps:$4 sm:$0xff]  }
 0x953   : > { %3371 = vmatprep.subr.bf16.mxu1 %v4173_v15  ;;  %v3835_v32 = vld [vmem:[#allocation7 + $0x98] ss:$12 sps:$4 sm:$0xff]   ;;  %v3839_v35 = vld [vmem:[#allocation7 + $0xb0] ss:$12 sps:$4 sm:$0xff]   ;;  %v3830_v36 = vld [vmem:[#allocation9 + $0x34] ss:$12 sps:$4 sm:$0xff]  }
 0x954   : > { %v3824_v34 = vld [vmem:[#allocation9 + $0x18] ss:$12 sps:$4 sm:$0xff]   ;;  %v3828_v37 = vld [vmem:[#allocation9 + $0x30] ss:$12 sps:$4 sm:$0xff]   ;;  %v3846_v38 = vld [vmem:[#allocation9 + $0x8] ss:$12 sps:$4 sm:$0xff]  }
 0x955   : > { %1767 = vmatpush1.bf16.msra.mxu0 %v3801_v20  ;;  %v3834_v7 = vld [vmem:[#allocation9 + $0x4c] ss:$12 sps:$4 sm:$0xff]   ;;  %v3832_v39 = vld [vmem:[#allocation9 + $0x48] ss:$12 sps:$4 sm:$0xff]   ;;  %v3838_v8 = vld [vmem:[#allocation9 + $0x64] ss:$12 sps:$4 sm:$0xff]  }
 0x956   : > { %1768 = vmatprep.subr.bf16.mxu0 %v3802_v9  ;;  %3372 = vmatpush3.bf16.msra.mxu1 %v3819_v51  ;;  %v3850_v40 = vld [vmem:[#allocation9 + $0x20] ss:$12 sps:$4 sm:$0xff]   ;;  %v3851_v42 = vld [vmem:[#allocation9 + $0x38] ss:$12 sps:$4 sm:$0xff]   ;;  %v3842_v43 = vld [vmem:[#allocation9 + $0x7c] ss:$12 sps:$4 sm:$0xff]  }
 0x957   : > { %3373 = vmatprep.subr.bf16.mxu1 %v4173_v15  ;;  %v3836_v41 = vld [vmem:[#allocation9 + $0x60] ss:$12 sps:$4 sm:$0xff]   ;;  %v3840_v44 = vld [vmem:[#allocation9 + $0x78] ss:$12 sps:$4 sm:$0xff]   ;;  %v3852_v45 = vld [vmem:[#allocation9 + $0x50] ss:$12 sps:$4 sm:$0xff]  }
 0x958   : > { %v3845_v11 = vld [vmem:[#allocation9 + $0x94] ss:$12 sps:$4 sm:$0xff]   ;;  %v3849_v46 = vld [vmem:[#allocation9 + $0xac] ss:$12 sps:$4 sm:$0xff]   ;;  %v3856_v57 = vld [vmem:[#allocation9 + $0xb0] ss:$12 sps:$4 sm:$0xff]  }
 0x959   : > { %1769 = vmatpush1.bf16.msra.mxu0 %v3804_v12  ;;  %v3853_v18 = vld [vmem:[#allocation9 + $0x68] ss:$12 sps:$4 sm:$0xff]   ;;  %v3854_v48 = vld [vmem:[#allocation9 + $0x80] ss:$12 sps:$4 sm:$0xff]   ;;  %v3855_v24 = vld [vmem:[#allocation9 + $0x98] ss:$12 sps:$4 sm:$0xff]  }
 0x95a   : > { %1770 = vmatprep.subr.bf16.mxu0 %v3805_v16  ;;  %3374 = vmatpush3.bf16.msra.mxu1 %v3823_v58  ;;  %v3847_v47 = vld [vmem:[#allocation9 + $0xa8] ss:$12 sps:$4 sm:$0xff]   ;;  %v1876_v6 = vld [vmem:[#allocation12] sm:$0x7]  ;;  %v1617_v63 = vld [vmem:[#allocation10] sm:$0x7] }
 0x95b   : > { %3375 = vmatprep.subr.bf16.mxu1 %v4173_v15  ;;  %v2009_v4 = vrot.slane %v1876_v6, %v4617_v0  ;;  %v1754_v59 = vrot.slane %v1617_v63, %v4625_v5  ;;  %v2013_v17 = vrot.slane %v1876_v6, %v4625_v5  ;;  %vm2205_vm12 = vcmask 64512   ;;  %s2693_s1 = sld [smem:[#allocation2 + %s4155_s26]]  ;;  %s4177_s23 = smov 1  }
 0x95c   : > { %s2835_s30 = scalar_lea.smem [#allocation19], %s4155_s26  ;;  %s2833_s12 = scalar_lea.smem [#allocation18], %s4155_s26 }
 0x95d   : > { %1771 = vmatpush1.bf16.msra.mxu0 %v3807_v28  ;;  %v3558_v21 = vadd.f32 %v2013_v17, %v1754_v59  ;;  %v3876_v59 = vld [vmem:[#allocation15 + $0x18] sm:$0xff]   ;;  %v3877_v17 = vld [vmem:[#allocation15 + $0x20] sm:$0xff]   ;;  %s1582_s26 = sadd.s32 1, %s4155_s26  }
 0x95e   : > { %1772 = vmatprep.subr.bf16.mxu0 %v3808_v14  ;;  %3376 = vmatpush3.bf16.msra.mxu1 %v3827_v19  ;;  %p1579_p0 = scmp.ge.s32.totalorder %s1582_s26, 8  }
 0x95f   : > { %3377 = vmatprep.subr.bf16.mxu1 %v4173_v15  ;;  %s4097_s9 = scalar_lea.hbm (%p1579_p0), %s5173_s15, 16 }
 0x960   :  { %p4098_p1 = scmp.ne.s32.totalorder (%p1579_p0), %s5173_s15, %s4097_s9  ;;  %p4101_p2 = scmp.lt.u32.totalorder (%p1579_p0), %s4097_s9, %s5173_s15 }
 0x961   : > { %1773 = vmatpush1.bf16.msra.mxu0 %v3810_v3 }
 0x962   : > { %1774 = vmatprep.subr.bf16.mxu0 %v3811_v60  ;;  %3378 = vmatpush3.bf16.msra.mxu1 %v3831_v29  ;;  %v2017_v29 = vrot.slane %v1876_v6, %v4643_v55  ;;  %v3864_v6 = vld [vmem:[#allocation13 + $0x78] sm:$0xff]   ;;  %p4103_p3 = pnand (%p1579_p0), %p4101_p2, %p4098_p1 }
 0x963   : > { %3379 = vmatprep.subr.bf16.mxu1 %v4173_v15 }
 0x965   : > { %1775 = vmatpush1.bf16.msra.mxu0 %v3814_v22 }
 0x966   : > { %1776 = vmatprep.subr.bf16.mxu0 %v3815_v26  ;;  %3380 = vmatpush3.bf16.msra.mxu1 %v3835_v32 }
 0x967   : > { %3381 = vmatprep.subr.bf16.mxu1 %v4173_v15 }
 0x969   : > { %1777 = vmatpush1.bf16.msra.mxu0 %v3818_v27 }
 0x96a   : > { %2021 = vmatprep.subr.bf16.mxu0 %v3822_v30  ;;  %3382 = vmatpush3.bf16.msra.mxu1 %v3839_v35 }
 0x96b   : > { %3387 = vmatprep.subr.bf16.mxu1 %v4173_v15 }
 0x96c   : > { %1795 = vmatmul.mubr.bf16.vlgmr.msra.gmra.mrb[0].mxu0 %v4151_v56 }
 0x96d   : > { %2022 = vmatpush1.bf16.msra.mxu0 %v3820_v1  ;;  %2053 = vmatprep.mubr.bf16.mxu0 %v4174_v13  ;;  %v1750_v13 = vrot.slane %v1617_v63, %v4617_v0  ;;  %v1758_v1 = vrot.slane %v1617_v63, %v4643_v55  ;;  %v3873_v63 = vld [vmem:[#allocation15] sm:$0xff]  }
 0x96e   : > { %2023 = vmatprep.subr.bf16.mxu0 %v3826_v33  ;;  %3384 = vmatmul.mubr.bf16.vlgmr.msra.gmra.mrb[0].mxu1 %v4151_v56  ;;  %v3843_v56 = vld [vmem:[#allocation9 + $0x90] ss:$12 sps:$4 sm:$0xff]  }
 0x96f   : > { %3388 = vmatpush3.bf16.msra.mxu1 %v3846_v38  ;;  %3403 = vmatprep.mubr.msk.bf16.mxu1 %vm4175_vm10, %v4173_v15  ;;  %v3556_v20 = vadd.f32 %v2009_v4, %v1750_v13  ;;  %v3874_v13 = vld [vmem:[#allocation15 + $0x8] sm:$0xff]   ;;  %v3875_v4 = vld [vmem:[#allocation15 + $0x10] sm:$0xff]  }
 0x970   : > { %3389 = vmatprep.subr.bf16.mxu1 %v4173_v15 }
 0x971   : > { %2024 = vmatpush1.bf16.msra.mxu0 %v3824_v34 }
 0x972   : > { %2025 = vmatprep.subr.bf16.mxu0 %v3830_v36 }
 0x973   : > { %3390 = vmatpush3.bf16.msra.mxu1 %v3850_v40 }
 0x974   : > { %3391 = vmatprep.subr.bf16.mxu1 %v4173_v15 }
 0x975   : > { %2026 = vmatpush1.bf16.msra.mxu0 %v3828_v37 }
 0x976   : > { %2027 = vmatprep.subr.bf16.mxu0 %v3834_v7 }
 0x977   : > { %3392 = vmatpush3.bf16.msra.mxu1 %v3851_v42 }
 0x978   : > { %3393 = vmatprep.subr.bf16.mxu1 %v4173_v15 }
 0x979   : > { %2028 = vmatpush1.bf16.msra.mxu0 %v3832_v39 }
 0x97a   : > { %2029 = vmatprep.subr.bf16.mxu0 %v3838_v8 }
 0x97b   : > { %3394 = vmatpush3.bf16.msra.mxu1 %v3852_v45 }
 0x97c   : > { %3395 = vmatprep.subr.bf16.mxu1 %v4173_v15 }
 0x97d   : > { %2030 = vmatpush1.bf16.msra.mxu0 %v3836_v41 }
 0x97e   : > { %2031 = vmatprep.subr.bf16.mxu0 %v3842_v43 }
 0x97f   : > { %3396 = vmatpush3.bf16.msra.mxu1 %v3853_v18 }
 0x980   : > { %3397 = vmatprep.subr.bf16.mxu1 %v4173_v15 }
 0x981   : > { %2032 = vmatpush1.bf16.msra.mxu0 %v3840_v44 }
 0x982   : > { %2033 = vmatprep.subr.bf16.mxu0 %v3845_v11 }
 0x983   : > { %3398 = vmatpush3.bf16.msra.mxu1 %v3854_v48  ;;  %v3859_v48 = vld [vmem:[#allocation13 + $0x50] sm:$0xff]  }
 0x984   : > { %3399 = vmatprep.subr.bf16.mxu1 %v4173_v15 }
 0x985   : > { %2034 = vmatpush1.bf16.msra.mxu0 %v3843_v56 }
 0x986   : > { %2035 = vmatprep.subr.bf16.mxu0 %v3849_v46  ;;  %v3857_v46 = vld [vmem:[#allocation13 + $0x40] sm:$0xff]  }
 0x987   : > { %3400 = vmatpush3.bf16.msra.mxu1 %v3855_v24  ;;  %v3861_v24 = vld [vmem:[#allocation13 + $0x60] sm:$0xff]  }
 0x988   : > { %3401 = vmatprep.subr.bf16.mxu1 %v4173_v15 }
 0x989   : > { %2036 = vmatpush1.bf16.msra.mxu0 %v3847_v47  ;;  %v3858_v47 = vld [vmem:[#allocation13 + $0x48] sm:$0xff]  }
 0x98a   : > { %3417 = vmatprep.subr.bf16.mxu0 %v4173_v15 }
 0x98b   : > { %3402 = vmatpush3.bf16.msra.mxu1 %v3856_v57  ;;  %v3862_v57 = vld [vmem:[#allocation13 + $0x68] sm:$0xff]  }
 0x98c   : > { %2054 = vmatmul.mubr.bf16.vlgmr.msra.gmra.mrb[0].mxu0 %v1843_v2  ;;  %3407 = vmatprep.subr.mxu1 %v4173_v15 }
 0x98d   : > { %3433 = vmatprep.mubr.msk.bf16.mxu0 %vm4175_vm10, %v4173_v15  ;;  %3418 = vmatpush3.bf16.msra.mxu0 %v3857_v46 }
 0x98e   : > { %3404 = vmatmul.mubr.bf16.vlgmr.msra.gmra.mrb[4].mxu1 %v1843_v2  ;;  %3419 = vmatprep.subr.bf16.mxu0 %v4173_v15  ;;  %v3860_v2 = vld [vmem:[#allocation13 + $0x58] sm:$0xff]  }
 0x98f   : > { %3409 = vmatprep.mubr.msk.f32.mxu1 %vm4175_vm10, %v4173_v15 }
 0x991   : > { %3420 = vmatpush3.bf16.msra.mxu0 %v3858_v47  ;;  %v2613_v47 = vld [vmem:[%s5161_s3 + $0x30] sm:$0xff] }
 0x992   : > { %3421 = vmatprep.subr.bf16.mxu0 %v4173_v15 }
 0x994   : > { %3408 = vmatpush3.xpose.msra.mxu1 %v4931_v49 }
 0x995   : > { %3412 = vmatprep.subr.mxu1 %v4173_v15  ;;  %3422 = vmatpush3.bf16.msra.mxu0 %v3859_v48  ;;  %v2614_v48 = vld [vmem:[%s5161_s3 + $0x38] sm:$0xff] }
 0x996   : > { %3423 = vmatprep.subr.bf16.mxu0 %v4173_v15 }
 0x999   : > { %3424 = vmatpush3.bf16.msra.mxu0 %v3860_v2  ;;  %v3542_v2 = vpack.c.bf16 %v2614_v48, %v2613_v47 }
 0x99a   : > { %3425 = vmatprep.subr.bf16.mxu0 %v4173_v15 }
 0x99d   : > { %3426 = vmatpush3.bf16.msra.mxu0 %v3861_v24  ;;  %v2615_v24 = vld [vmem:[%s5161_s3 + $0x40] sm:$0xff] }
 0x99e   : > { %3427 = vmatprep.subr.bf16.mxu0 %v4173_v15 }
 0x9a1   : > { %3428 = vmatpush3.bf16.msra.mxu0 %v3862_v57  ;;  %v2616_v57 = vld [vmem:[%s5161_s3 + $0x48] sm:$0xff] }
 0x9a2   : > { %3429 = vmatprep.subr.bf16.mxu0 %v4173_v15 }
 0xa41   : > { %v1837_v61 = vpop.f32.mrb[0].mxu1 }
 0xa42   : > { %v3385_v62 = vpop.f32.mrb[1].mxu1  ;;  %v1838_v35 = vadd.f32 %v1837_v61, %v1758_v1  ;;  %v3863_v61 = vld [vmem:[#allocation13 + $0x70] sm:$0xff]  }
 0xa43   : > { %v1840_v31 = vpop.f32.mrb[2].mxu1  ;;  %3430 = vmatpush3.bf16.msra.mxu0 %v3863_v61  ;;  %v3545_v61 = vpack.c.bf16 %v2616_v57, %v2615_v24 }
 0xa44   : > { %v3386_v10 = vpop.f32.mrb[3].mxu1  ;;  %3431 = vmatprep.subr.bf16.mxu0 %v4173_v15 }
 0xa47   : > { %3432 = vmatpush3.bf16.msra.mxu0 %v3864_v6 }
 0xa48   : > { %3437 = vmatprep.subr.bf16.mxu0 %v4173_v15 }
 0xa5f   : > { %v2055_v9 = vpop.f32.mrb[0].mxu0 }
 0xa60   : > { %v3557_v12 = vadd.f32 %v3556_v20, %v2055_v9  ;;  %v2057_v16 = vpop.f32.mrb[1].mxu0 }
 0xa61   : > { %v2059_v25 = vpop.f32.mrb[2].mxu0  ;;  %v3559_v14 = vadd.f32 %v3558_v21, %v2057_v16  ;;  %v2096_v58 = vpop.f32.mrb[4].mxu1 }
 0xa62   : > { %v2995_v28 = vmul.f32 -1.442695, %v3557_v12  ;;  %v2060_v51 = vpop.f32.mrb[3].mxu0  ;;  %v3405_v60 = vpop.f32.mrb[5].mxu1  ;;  %v2097_v33 = vadd.f32 %v2096_v58, %v2017_v29  ;;  %v3865_v12 = vld [vmem:[#allocation13] sm:$0xff]   ;;  %v3866_v25 = vld [vmem:[#allocation13 + $0x8] sm:$0xff]  }
 0xa63   : > { %v2996_v3 = vmul.f32 -1.442695, %v3559_v14  ;;  %v2099_v22 = vpop.f32.mrb[6].mxu1  ;;  %v3868_v51 = vld [vmem:[#allocation13 + $0x18] sm:$0xff]   ;;  %v3869_v14 = vld [vmem:[#allocation13 + $0x20] sm:$0xff]   ;;  %v3871_v58 = vld [vmem:[#allocation13 + $0x30] sm:$0xff]  }
 0xa64   : > { %3889 = vpow2.f32 %v2995_v28  ;;  %v3406_v19 = vpop.f32.mrb[7].mxu1  ;;  %v3867_v28 = vld [vmem:[#allocation13 + $0x10] sm:$0xff]   ;;  %v3872_v60 = vld [vmem:[#allocation13 + $0x38] sm:$0xff]  }
 0xa65   : > { %3891 = vpow2.f32 %v2996_v3  ;;  %v3870_v3 = vld [vmem:[#allocation13 + $0x28] sm:$0xff]  }
 0xa66   : > { %v3878_v19 = vld [vmem:[#allocation15 + $0x28] sm:$0xff]  }
 0xa6e   : > { %v3890_v26 = vpop.eup %3889 }
 0xa6f   : > { %v2106_v27 = vadd.f32 1.0, %v3890_v26  ;;  %v3892_v30 = vpop.eup %3891  ;;  %v3879_v26 = vld [vmem:[#allocation15 + $0x30] sm:$0xff]  }
 0xa70   : > { %v2113_v32 = vadd.f32 1.0, %v3892_v30 }
 0xa71   : > { %3893 = vrcp.f32 %v2106_v27  ;;  %v3880_v27 = vld [vmem:[#allocation15 + $0x38] sm:$0xff]  }
 0xa72   : > { %3895 = vrcp.f32 %v2113_v32 }
 0xa7b   : > { %v3894_v34 = vpop.eup %3893 }
 0xa7c   : > { %v2116_v36 = vmul.f32 %v3894_v34, %v2097_v33  ;;  %v3896_v38 = vpop.eup %3895 }
 0xa7d   : > { %v2119_v7 = vsub.f32 1.0, %v3896_v38  ;;  %v2121_v8 = vmul.f32 %v4147_v50, %v3896_v38 }
 0xa7e   : > { %v2117_v37 = vadd.f32 %v2116_v36, %v1838_v35  ;;  %v2507_v35 = vld [vmem:[#allocation16] sm:$0x1] }
 0xa80   : > { %3897 = vtanh.f32 %v2117_v37 }
 0xa8a   : > { %v3898_v39 = vpop.eup %3897 }
 0xa8b   : > { %v2120_v40 = vmul.f32 %v3898_v39, %v2119_v7 }
 0xa8d   : > { %v4993_v50 = vadd.f32 %v2121_v8, %v2120_v40   ;;  %v2607_v8 = vld [vmem:[%s5161_s3] sm:$0xff] }
 0xa8f   : > { %3410 = vmatmul.mubr.f32.vlgmr.msra.gmra.mrb[8].mxu1 %v4993_v50  ;;  %v2279_v22 = vpack.c.bf16 %v4993_v50, %v4993_v50 }
 0xa90   : > { %3413 = vmatpush3.msra.mxu1 %v4931_v49  ;;  %3414 = vmatprep.mubr.msk.f32.mxu1 %vm4175_vm10, %v4173_v15 }
 0xa91   : > { %3457 = vmatprep.subr.bf16.mxu1 %v4173_v15 }
 0xb62   : > { %v2189_v41 = vpop.f32.mrb[8].mxu1 }
 0xb63   : > { %v3411_v42 = vpop.f32.mrb[9].mxu1  ;;  %v2194_v43 = vsel %vm2193_vm11, %v2189_v41, -inf }
 0xb64   : > { %2195 = vmax.xlane.f32.xlu0 %v2194_v43  ;;  %v2609_v42 = vld [vmem:[%s5161_s3 + $0x10] sm:$0xff]  ;;  %v4176_v43 = vmov 0.0|0.0  }
 0xbf1   : > { %v2196_v44 = vpop.xlane.xlu0 %2195 }
 0xbf2   : > { %v2197_v45 = vsub.f32 %v2189_v41, %v2196_v44  ;;  %v2608_v41 = vld [vmem:[%s5161_s3 + $0x8] sm:$0xff] }
 0xbf3   : > { %v3533_v44 = vpack.c.bf16 %v2608_v41, %v2607_v8 }
 0xbf4   : > { %v2198_v11 = vmul.f32 1.442695, %v2197_v45  ;;  %v2610_v45 = vld [vmem:[%s5161_s3 + $0x18] sm:$0xff] }
 0xbf6   : > { %3899 = vpow2.f32 %v2198_v11  ;;  %v3536_v11 = vpack.c.bf16 %v2610_v45, %v2609_v42 }
 0xc00   : > { %v3900_v56 = vpop.eup %3899 }
 0xc01   : > { %v2200_v18 = vsel %vm2193_vm11, %v3900_v56, 0.0 }
 0xc02   : > { %2201 = vadd.xlane.f32.xlu0 %v2200_v18  ;;  %v2612_v18 = vld [vmem:[%s5161_s3 + $0x28] sm:$0xff] }
 0xc8f   : > { %v2202_v62 = vpop.xlane.xlu0 %2201 }
 0xc90   : > { %3901 = vrcp.f32 %v2202_v62 }
 0xc9a   : > { %v3902_v31 = vpop.eup %3901 }
 0xc9b   : > { %v2204_v10 = vmul.f32 %v3902_v31, %v3900_v56  ;;  %v2611_v56 = vld [vmem:[%s5161_s3 + $0x20] sm:$0xff] }
 0xc9c   : > { %v3539_v46 = vpack.c.bf16 %v2612_v18, %v2611_v56 }
 0xc9d   : > { %3415 = vmatmul.mubr.msk.f32.vlgmr.msra.gmra.mrb[10].mxu1 %vm2205_vm12, %v2204_v10 }
 0xc9e   : > { %3473 = vmatprep.mubr.msk.bf16.mxu1 %vm4175_vm10, %v4173_v15  ;;  %3458 = vmatpush3.bf16.msra.mxu1 %v3873_v63 }
 0xc9f   : > { %3459 = vmatprep.subr.bf16.mxu1 %v4173_v15 }
 0xca2   : > { %3460 = vmatpush3.bf16.msra.mxu1 %v3874_v13  ;;  %v2617_v13 = vld [vmem:[%s5161_s3 + $0x50] sm:$0xff] }
 0xca3   : > { %3461 = vmatprep.subr.bf16.mxu1 %v4173_v15 }
 0xca6   : > { %3462 = vmatpush3.bf16.msra.mxu1 %v3875_v4  ;;  %v2618_v4 = vld [vmem:[%s5161_s3 + $0x58] sm:$0xff] }
 0xca7   : > { %3463 = vmatprep.subr.bf16.mxu1 %v4173_v15 }
 0xcaa   : > { %3464 = vmatpush3.bf16.msra.mxu1 %v3876_v59  ;;  %v3548_v59 = vpack.c.bf16 %v2618_v4, %v2617_v13 }
 0xcab   : > { %3465 = vmatprep.subr.bf16.mxu1 %v4173_v15 }
 0xcae   : > { %3466 = vmatpush3.bf16.msra.mxu1 %v3877_v17  ;;  %v2619_v17 = vld [vmem:[%s5161_s3 + $0x60] sm:$0xff] }
 0xcaf   : > { %3467 = vmatprep.subr.bf16.mxu1 %v4173_v15 }
 0xcb2   : > { %3468 = vmatpush3.bf16.msra.mxu1 %v3878_v19  ;;  %v3886_v19 = vld [vmem:[%s5160_s2 + $0x28] sm:$0xff]  }
 0xcb3   : > { %3469 = vmatprep.subr.bf16.mxu1 %v4173_v15 }
 0xcb6   : > { %3470 = vmatpush3.bf16.msra.mxu1 %v3879_v26  ;;  %v3887_v26 = vld [vmem:[%s5160_s2 + $0x30] sm:$0xff]  }
 0xcb7   : > { %3471 = vmatprep.subr.bf16.mxu1 %v4173_v15 }
 0xcba   : > { %3472 = vmatpush3.bf16.msra.mxu1 %v3880_v27  ;;  %v3888_v27 = vld [vmem:[%s5160_s2 + $0x38] sm:$0xff]  }
 0xcbb   : > { %3532 = vmatprep.subr.bf16.mxu1 %v4176_v43 }
 0xd70   : > { %v2275_v20 = vpop.f32.mrb[10].mxu1 }
 0xd71   : > { %v2276_v9 = vadd.f32 %v2275_v20, %v4935_v23  ;;  %v3416_v21 = vpop.f32.mrb[11].mxu1  ;;  %v2620_v20 = vld [vmem:[%s5161_s3 + $0x68] sm:$0xff] }
 0xd72   : > { %v2621_v21 = vld [vmem:[%s5161_s3 + $0x70] sm:$0xff] }
 0xd73   : > { %v2296_v16 = vpack.c.bf16 %v2276_v9, %v2276_v9  ;;  %v3551_v9 = vpack.c.bf16 %v2620_v20, %v2619_v17 }
 0xd75   : > { %3434 = vmatmul.mubr.bf16.vlgmr.msra.gmra.mrb[4].mxu0 %v2296_v16 }
 0xd76   : > { %3438 = vmatpush3.bf16.msra.mxu0 %v3865_v12  ;;  %3453 = vmatprep.mubr.msk.bf16.mxu0 %vm4175_vm10, %v4173_v15  ;;  %v2622_v12 = vld [vmem:[%s5161_s3 + $0x78] sm:$0xff] }
 0xd77   : > { %3439 = vmatprep.subr.bf16.mxu0 %v4173_v15  ;;  %v3554_v16 = vpack.c.bf16 %v2622_v12, %v2621_v21 }
 0xd7a   : > { %3440 = vmatpush3.bf16.msra.mxu0 %v3866_v25 }
 0xd7b   : > { %3441 = vmatprep.subr.bf16.mxu0 %v4173_v15 }
 0xd7e   : > { %3442 = vmatpush3.bf16.msra.mxu0 %v3867_v28 }
 0xd7f   : > { %3443 = vmatprep.subr.bf16.mxu0 %v4173_v15 }
 0xd82   : > { %3444 = vmatpush3.bf16.msra.mxu0 %v3868_v51 }
 0xd83   : > { %3445 = vmatprep.subr.bf16.mxu0 %v4173_v15 }
 0xd86   : > { %3446 = vmatpush3.bf16.msra.mxu0 %v3869_v14  ;;  %v3881_v14 = vld [vmem:[%s5160_s2] sm:$0xff]  }
 0xd87   : > { %3447 = vmatprep.subr.bf16.mxu0 %v4173_v15 }
 0xd8a   : > { %3448 = vmatpush3.bf16.msra.mxu0 %v3870_v3  ;;  %v3882_v3 = vld [vmem:[%s5160_s2 + $0x8] sm:$0xff]  }
 0xd8b   : > { %3449 = vmatprep.subr.bf16.mxu0 %v4173_v15 }
 0xd8e   : > { %3450 = vmatpush3.bf16.msra.mxu0 %v3871_v58  ;;  %v3883_v58 = vld [vmem:[%s5160_s2 + $0x10] sm:$0xff]  }
 0xd8f   : > { %3451 = vmatprep.subr.bf16.mxu0 %v4173_v15 }
 0xd92   : > { %3452 = vmatpush3.bf16.msra.mxu0 %v3872_v60  ;;  %v3884_v60 = vld [vmem:[%s5160_s2 + $0x18] sm:$0xff]  }
 0xd93   : > { %3512 = vmatprep.subr.bf16.mxu0 %v4173_v15 }
 0xd95   : > { %3454 = vmatmul.mubr.bf16.vlgmr.msra.gmra.mrb[4].mxu0 %v2279_v22  ;;  %v3885_v22 = vld [vmem:[%s5160_s2 + $0x20] sm:$0xff]  }
 0xd96   : > { %3528 = vmatprep.mubr.msk.bf16.mxu0 %vm4175_vm10, %v4173_v15  ;;  %3513 = vmatpush3.bf16.msra.mxu0 %v3881_v14 }
 0xd97   : > { %3514 = vmatprep.subr.bf16.mxu0 %v4173_v15 }
 0xd9a   : > { %3515 = vmatpush3.bf16.msra.mxu0 %v3882_v3 }
 0xd9b   : > { %3516 = vmatprep.subr.bf16.mxu0 %v4173_v15 }
 0xd9e   : > { %3517 = vmatpush3.bf16.msra.mxu0 %v3883_v58 }
 0xd9f   : > { %3518 = vmatprep.subr.bf16.mxu0 %v4173_v15 }
 0xda2   : > { %3519 = vmatpush3.bf16.msra.mxu0 %v3884_v60 }
 0xda3   : > { %3520 = vmatprep.subr.bf16.mxu0 %v4173_v15 }
 0xda6   : > { %3521 = vmatpush3.bf16.msra.mxu0 %v3885_v22 }
 0xda7   : > { %3522 = vmatprep.subr.bf16.mxu0 %v4173_v15 }
 0xdaa   : > { %3523 = vmatpush3.bf16.msra.mxu0 %v3886_v19 }
 0xdab   : > { %3524 = vmatprep.subr.bf16.mxu0 %v4173_v15 }
 0xdae   : > { %3525 = vmatpush3.bf16.msra.mxu0 %v3887_v26 }
 0xdaf   : > { %3526 = vmatprep.subr.bf16.mxu0 %v4173_v15 }
 0xdb2   : > { %3527 = vmatpush3.bf16.msra.mxu0 %v3888_v27 }
 0xe68   : > { %v2483_v29 = vpop.f32.mrb[4].mxu0 }
 0xe69   : > { %3903 = vtanh.f32 %v2483_v29  ;;  %v3455_v30 = vpop.f32.mrb[5].mxu0  ;;  %v2694_v29 = vstv %s2693_s1 }
 0xe6a   : > { %v2486_v1 = vpop.f32.mrb[6].mxu0 }
 0xe6b   : > { %v3456_v32 = vpop.f32.mrb[7].mxu0 }
 0xe73   : > { %v3904_v33 = vpop.eup %3903 }
 0xe74   : > { %v2490_v34 = vpack.c.bf16 %v3904_v33, %v3904_v33 }
 0xe76   : > { %3474 = vmatmul.mubr.bf16.vlgmr.msra.gmra.mrb[12].mxu1 %v2490_v34 }
 0xe77   : > { %3509 = vmatprep.mubr.msk.f32.mxu1 %vm4175_vm10, %v4173_v15  ;;  %3534 = vmatpush3.bf16.msra.mxu1 %v3533_v44 }
 0xe78   : > { %3535 = vmatprep.subr.bf16.mxu1 %v4176_v43 }
 0xe7b   : > { %3537 = vmatpush3.bf16.msra.mxu1 %v3536_v11 }
 0xe7c   : > { %3538 = vmatprep.subr.bf16.mxu1 %v4176_v43 }
 0xe7f   : > { %3540 = vmatpush3.bf16.msra.mxu1 %v3539_v46 }
 0xe80   : > { %3541 = vmatprep.subr.bf16.mxu1 %v4176_v43 }
 0xe83   : > { %3543 = vmatpush3.bf16.msra.mxu1 %v3542_v2 }
 0xe84   : > { %3544 = vmatprep.subr.bf16.mxu1 %v4176_v43 }
 0xe87   : > { %3546 = vmatpush3.bf16.msra.mxu1 %v3545_v61 }
 0xe88   : > { %3547 = vmatprep.subr.bf16.mxu1 %v4176_v43 }
 0xe8b   : > { %3549 = vmatpush3.bf16.msra.mxu1 %v3548_v59 }
 0xe8c   : > { %3550 = vmatprep.subr.bf16.mxu1 %v4176_v43 }
 0xe8f   : > { %3552 = vmatpush3.bf16.msra.mxu1 %v3551_v9 }
 0xe90   : > { %3553 = vmatprep.subr.bf16.mxu1 %v4176_v43 }
 0xe93   : > { %3555 = vmatpush3.bf16.msra.mxu1 %v3554_v16 }
 0xf49   : > { %v2590_v36 = vpop.f32.mrb[12].mxu1 }
 0xf4a   : > { %v2591_v37 = vadd.f32 %v2590_v36, %v2507_v35  ;;  %v3475_v38 = vpop.f32.mrb[13].mxu1 }
 0xf4b   : > { %v2593_v7 = vpop.f32.mrb[14].mxu1 }
 0xf4c   : > { %v3476_v39 = vpop.f32.mrb[15].mxu1  ;;  %v2596_v40 = vsel %vm1537_vm3, %v2591_v37, -inf }
 0xf4d   : > { %2597 = vmax.xlane.f32.xlu1 %v2596_v40 }
 0xfda   : > { %v2598_v62 = vpop.xlane.xlu1 %2597 }
 0xfdb   : > { %v2599_v31 = vsub.f32 %v2591_v37, %v2598_v62 }
 0xfdd   : > { %v2600_v10 = vmul.f32 1.442695, %v2599_v31 }
 0xfdf   : > { %3905 = vpow2.f32 %v2600_v10 }
 0xfe9   : > { %v3906_v6 = vpop.eup %3905 }
 0xfea   : > { %v2602_v63 = vsel %vm1537_vm3, %v3906_v6, 0.0 }
 0xfeb   : > { %2603 = vadd.xlane.f32.xlu1 %v2602_v63 }
0x1078   : > { %v2604_v25 = vpop.xlane.xlu1 %2603 }
0x1079   : > { %3907 = vrcp.f32 %v2604_v25 }
0x1083   : > { %v3908_v28 = vpop.eup %3907 }
0x1084   : > { %v2606_v51 = vmul.f32 %v3908_v28, %v3906_v6 }
0x1086   : > { %3510 = vmatmul.mubr.f32.vlgmr.msra.gmra.mrb[16].mxu1 %v2606_v51 }
0x1159   : > { %v2689_v30 = vpop.f32.mrb[16].mxu1 }
0x115a   : > { %vm2695_vm13 = vcmp.gt.f32.partialorder %v2689_v30, %v2694_v29  ;;  %v3511_v1 = vpop.f32.mrb[17].mxu1 }
0x115b   : > { %v3022_v32 = vsel %vm2695_vm13, 1.0, %v4173_v15 }
0x115c   : > { %v2698_v33 = vmax.f32 %v3022_v32, %v4615_v54 }
0x115e   : > { %2699 = vrot.lane.b32.xlu0 %v2698_v33, %s4177_s23 }
0x11d0   : > { %v2700_v34 = vpop.permute.xlu0 %2699 }
0x11d1   : > { %v2701_v35 = vsel %vm1562_vm1, 0.0, %v2700_v34 }
0x11d2   : > { %v2702_v36 = vsub.f32 1.0, %v2701_v35 }
0x11d4   : > { %v2703_v37 = vmul.f32 %v2702_v36, %v2698_v33 }
0x11d6   : > { %v2704_v38 = vpack.c.bf16 %v2703_v37, %v2703_v37  ;;  %v2810_v7 = vmul.f32 %v2703_v37, %v1561_v53  ;;  %v2822_v40 = vmul.f32 %v2703_v37, %v2606_v51 }
0x11d8   : > { %3529 = vmatmul.mubr.bf16.vlgmr.msra.gmra.mrb[8].mxu0 %v2704_v38  ;;  %v2811_v39 = vsel %vm1537_vm3, %v2810_v7, 0.0  ;;  %v2823_v15 = vsel %vm1537_vm3, %v2822_v40, 0.0 }
0x11d9   : > { %2812 = vadd.xlane.f32.xlu1 %v2811_v39 }
0x11dd   : > { %2824 = vadd.xlane.f32.xlu1 %v2823_v15 }
0x1266   : > { %v2813_v8 = vpop.xlane.xlu1 %2812 }
0x1267   : > { %v2814_v41 = vrot.slane %v2813_v8, 4 }
0x1269   : > { %v2815_v42 = vadd.f32 %v2814_v41, %v2813_v8 }
0x126a   : > { %v2825_v43 = vpop.xlane.xlu1 %2824 }
0x126b   : > { %v2816_v44 = vrot.slane %v2815_v42, 2  ;;  %v2826_v45 = vrot.slane %v2825_v43, 4 }
0x126d   : > { %v2827_v11 = vadd.f32 %v2826_v45, %v2825_v43  ;;  %v2817_v56 = vadd.f32 %v2816_v44, %v2815_v42 }
0x126f   : > { %v2828_v18 = vrot.slane %v2827_v11, 2  ;;  %v2818_v46 = vrot.slane %v2817_v56, 1 }
0x1271   : > { %v2829_v47 = vadd.f32 %v2828_v18, %v2827_v11  ;;  %v2819_v48 = vadd.f32 %v2818_v46, %v2817_v56 }
0x1273   : > { %3568 = vpush %v2819_v48  ;;  %v2830_v2 = vrot.slane %v2829_v47, 1 }
0x1275   : > { %v2831_v24 = vadd.f32 %v2830_v2, %v2829_v47 }
0x1277   : > { %3575 = vpush %v2831_v24 }
0x12a4   : > { %s3569_s6 = spop %3568 }
0x12a5   : > { %p3570_p13 = scmp.lt.s32.totalorder %s3569_s6, 0  ;;  %s3571_s7 = sceil.f32 %s3569_s6 }
0x12a6   : > { %s3572_s29 = sfloor.f32 %s3569_s6 }
0x12a7   : > { %s5184_s7 = smov (!%p3570_p13, %s3571_s7), %s3572_s29 }
0x12a8   : > { %s3576_s11 = spop %3575  ;;  %s3574_s27 = scvt.f32.s32 %s5184_s7 }
0x12a9   : > { %2836 = sst [smem:[%s2835_s30]] %s3576_s11  ;;  %1581 = sbr.rel (!%p1579_p0) target bundleno = 2378 (0x94a), region = 133 }
0x12aa   : > { %2834 = sst [smem:[%s2833_s12]] %s3574_s27 }
0x12ab   : > { %v2803_v57 = vpop.f32.mrb[8].mxu0 }
0x12ac   : > { %v2809_v56 = vpack.c.bf16 %v2803_v57, %v2803_v57   ;;  %v3530_v61 = vpop.f32.mrb[9].mxu0 }
0x12ad   : > { %v2806_v62 = vpop.f32.mrb[10].mxu0 }
0x12ae   : > { %v3531_v31 = vpop.f32.mrb[11].mxu0 }
0x12b0   :  { %4106 = shalt.err (!%p4103_p3)
}
0x12b1   :  { %s4178_s5 = smov [#allocation18]   ;;  %s4107_s3 = scalar_lea.hbm %s5174_s16, 16 }
0x12b2   :  { %2844 = dma.smem_to_hbm %s4178_s5, 16, %s5173_s15, [#allocation4]  }
0x12b3   :  { %p4108_p4 = scmp.ne.s32.totalorder %s5174_s16, %s4107_s3  ;;  %p4111_p5 = scmp.lt.u32.totalorder %s4107_s3, %s5174_s16 }
0x12b5   :  { %p4113_p6 = pnand %p4111_p5, %p4108_p4 }
0x12b7   :  { %4116 = shalt.err (!%p4113_p6)
}
0x12b8   :  { %s4179_s10 = smov [#allocation19]  }
0x12b9   :  { %2852 = dma.smem_to_hbm %s4179_s10, 16, %s5174_s16, [#allocation20]  }
0x12ba   :  { %4141 = dma.done.wait [#allocation4], 16  }
0x12bb   :  { %4142 = vsyncadd [#allocation4], 4294967280 }
0x12bc   :  { %4143 = dma.done.wait [#allocation20], 16  }
0x12bd   :  { %4144 = vsyncadd [#allocation20], 4294967280 }
0x12be   :  { %2859 = sfence }
0x12bf   :  { %2860 = vsyncpa [#allocation3], 1 }
0x12c0   :  { %2861 = vsyncpa [#allocation8], 1 }
0x12c1   :  { %2862 = vsyncpa [#allocation11], 1 }
0x12c2   :  { %2863 = vsyncpa [#allocation14], 1 }
0x12c3   :  { %2864 = vsyncpa [#allocation17], 1 }
0x12c4   :  { %2865 = vsyncpa [#allocation4], 1 }
0x12c5   :  { %2866 = vsyncpa [#allocation20], 1 }
0x12c6   :  { %2867 = vsyncpa [#allocation5], 1 }

</bundles_post_ra>
